<compile_context>
chip_gen: v7x
topology: tpu7x:2x2x1
jax: 0.10.0
libtpu: 0.0.40
codegen_flags: <defaults>
</compile_context>

<pallas_src>
import numpy as np
import jax
import jax.numpy as jnp
from jax.experimental import pallas as pl
from jax.experimental.pallas import tpu as pltpu

HIDDEN = 32
LOG_2PI = float(np.log(2.0 * np.pi))
_LANE = 128


def cond_a2b_kernel(a_ref, b_ref, w2_ref, vec_ref, out_ref):
    # a_ref, b_ref : (C, TN) f32   -- conditioning A / density target B (chunked batch)
    # w2_ref       : (C*H, C*H) bf16 block-diagonal layer-2 weight (chunk-major)
    # vec_ref      : (8, C, H) f32 packed per-feature vectors:
    #                0: W1 row  1: b1  2: b2  3: Wmu  4: Wlv  5: bmu/H  6: blv/H  7: pad
    # out_ref      : (C, TN) f32  log p(B|A)
    C, tile_n = out_ref.shape
    CH = w2_ref.shape[0]
    H = CH // C

    a = a_ref[...][:, None, :]                      # (C, 1, TN)
    b = b_ref[...]                                  # (C, TN)

    vec = vec_ref[...]                              # (8, C, H)
    w1c = vec[0][:, :, None]                        # (C, H, 1)
    b1c = vec[1][:, :, None]
    b2c = vec[2][:, :, None]
    wmuc = vec[3][:, :, None]
    wlvc = vec[4][:, :, None]
    bmuc = vec[5][:, :, None]                       # bmu / H (folded head bias)
    blvc = vec[6][:, :, None]                       # blv / H

    # Layer 1 (VPU): K=1 contraction as a broadcast FMA in the chunk-stacked layout.
    h1 = jnp.maximum(w1c * a + b1c, 0.0)            # (C, H, TN) f32

    # Layer 2 (MXU): block-diagonal bf16 matmul, contraction depth C*H (128/256).
    # (C, H, TN) -> (C*H, TN) is a pure relabeling (H is a multiple of 8).
    h1_bf = h1.reshape(CH, tile_n).astype(jnp.bfloat16)
    h2 = jnp.dot(w2_ref[...], h1_bf, preferred_element_type=jnp.float32)
    h2 = jnp.maximum(h2.reshape(C, H, tile_n) + b2c, 0.0)   # (C, H, TN) f32

    # mu / logvar heads: VPU multiply + grouped sublane reduction (no MXU pass).
    mu = jnp.sum(h2 * wmuc + bmuc, axis=1)          # (C, TN)
    logvar = jnp.sum(h2 * wlvc + blvc, axis=1)      # (C, TN)

    # Gaussian log-density tail, fully f32; lane-dense store.
    diff = b - mu
    out_ref[...] = -0.5 * (LOG_2PI + logvar + diff * diff * jnp.exp(-logvar))


def _default_chunks():
    # 4 stacked chunks (128-deep contraction) on 128-wide-MXU parts (v2..v5),
    # 8 chunks (256-deep) on v6e / v7x whose MXUs are 256 wide.
    try:
        kind = jax.devices()[0].device_kind.lower()
    except Exception:
        return 8
    if any(tag in kind for tag in ("v2", "v3", "v4", "v5")):
        return 4
    return 8


def _choose_tiling(n, c, max_tile_elems):
    # Per-chunk lane width (multiple of 128) and number of grid steps.
    lane_cap = max(_LANE, (max_tile_elems // c) // _LANE * _LANE)
    # Keep >= 2 "parallel" grid steps when the batch is big enough so both
    # TensorCores can be used on v7x (megacore sharding of the grid axis).
    min_steps = 2 if n >= 2 * c * _LANE else 1
    per_chunk = -(-n // (c * min_steps))            # ceil
    per_chunk = -(-per_chunk // _LANE) * _LANE      # round up to a lane multiple
    tile_n = min(lane_cap, per_chunk)
    steps = -(-n // (c * tile_n))                   # ceil
    return tile_n, steps


def conditional_model_a2b(x, params, *, chunks=None, max_tile_elems=16384):
    """log p(B | A) for x of shape (N, 2) with columns [A, B]."""
    N, two = x.shape
    assert two == 2, "dim=1 must have size 2 (split into A and B)"
    w1, b1, w2, b2, wmu, bmu, wlv, blv = params
    H = w1.shape[1]

    C = _default_chunks() if chunks is None else chunks
    tile_n, steps = _choose_tiling(N, C, max_tile_elems)
    n_pad = steps * C * tile_n
    nc = n_pad // C
    CH = C * H

    # --- wrapper-side prep (tiny; in a real model the weight packing is done once) ---
    if n_pad != N:
        x = jnp.pad(x, ((0, n_pad - N), (0, 0)))    # keeps tiles lane-dense / unmasked
    a_chunked = x[:, 0].reshape(C, nc)              # chunk-contiguous batch split
    b_chunked = x[:, 1].reshape(C, nc)

    # Block-diagonal layer-2 weight (chunk-major), bf16 for the MXU.
    w2_bd = jnp.kron(jnp.eye(C, dtype=jnp.float32), w2.T).astype(jnp.bfloat16)

    def plane(v):                                   # (H,) -> (C, H)
        return jnp.broadcast_to(v.reshape(1, H), (C, H))

    vec = jnp.stack([
        plane(w1.reshape(H)),                                   # 0: W1 row
        plane(b1.reshape(H)),                                   # 1: b1
        plane(b2.reshape(H)),                                   # 2: b2
        plane(wmu.reshape(H)),                                  # 3: Wmu
        plane(wlv.reshape(H)),                                  # 4: Wlv
        jnp.broadcast_to(bmu.reshape(1, 1) / H, (C, H)),        # 5: bmu / H
        jnp.broadcast_to(blv.reshape(1, 1) / H, (C, H)),        # 6: blv / H
        jnp.zeros((C, H), jnp.float32),                         # 7: pad
    ], axis=0).astype(jnp.float32)                  # (8, C, H)

    out = pl.pallas_call(
        cond_a2b_kernel,
        out_shape=jax.ShapeDtypeStruct((C, nc), jnp.float32),
        grid=(steps,),
        in_specs=[
            pl.BlockSpec((C, tile_n), lambda i: (0, i)),    # A (batch on lanes)
            pl.BlockSpec((C, tile_n), lambda i: (0, i)),    # B
            pl.BlockSpec((CH, CH), lambda i: (0, 0)),       # block-diag W2 (bf16)
            pl.BlockSpec((8, C, H), lambda i: (0, 0, 0)),   # packed vector slab
        ],
        out_specs=pl.BlockSpec((C, tile_n), lambda i: (0, i)),  # lane-dense output
        compiler_params=pltpu.CompilerParams(
            dimension_semantics=("parallel",),
            vmem_limit_bytes=48 * 1024 * 1024),
    )(a_chunked, b_chunked, w2_bd, vec)

    # Undo chunking / padding: (C, nc) is chunk-contiguous in batch order.
    return out.reshape(-1)[:N].reshape(N, 1)


def init_params(key, hidden=HIDDEN):
    # deterministic, PyTorch-Linear-style uniform(-1/sqrt(fan_in), +1/sqrt(fan_in))
    ks = jax.random.split(key, 8)

    def lin(kw, kb, fan_in, fan_out):
        bound = 1.0 / np.sqrt(fan_in)
        w = jax.random.uniform(kw, (fan_in, fan_out), jnp.float32, -bound, bound)
        b = jax.random.uniform(kb, (1, fan_out), jnp.float32, -bound, bound)
        return w, b

    w1, b1 = lin(ks[0], ks[1], 1, hidden)
    w2, b2 = lin(ks[2], ks[3], hidden, hidden)
    wmu, bmu = lin(ks[4], ks[5], hidden, 1)
    wlv, blv = lin(ks[6], ks[7], hidden, 1)
    return (w1, b1, w2, b2, wmu, bmu, wlv, blv)


def reference(x, params):
    # Pure-JAX f32 reference in the original (batch, features) layout.
    w1, b1, w2, b2, wmu, bmu, wlv, blv = params
    a, b = x[:, 0:1], x[:, 1:2]
    h = jnp.maximum(a @ w1 + b1, 0.0)
    h = jnp.maximum(h @ w2 + b2, 0.0)
    mu = h @ wmu + bmu
    logvar = h @ wlv + blv
    return -0.5 * (LOG_2PI + logvar + (b - mu) ** 2 * jnp.exp(-logvar))


if __name__ == "__main__":
    key = jax.random.PRNGKey(0)
    k_x, k_p = jax.random.split(key)
    params = init_params(k_p, HIDDEN)

    # Two sizes: a tiny one (single grid step + padding path) and one that
    # exercises padding plus a multi-step "parallel" grid.
    for n in (100, 5000):
        kx = jax.random.fold_in(k_x, n)
        x = jax.random.normal(kx, (n, 2), jnp.float32)

        out = jax.block_until_ready(conditional_model_a2b(x, params))
        ref = reference(x, params)

        # Tolerance relaxed vs. the pure-f32 reference because the layer-2
        # matmul inputs are bf16 on the MXU (per review); the Gaussian tail
        # stays f32. Observed deviation is O(1e-3..1e-2) relative.
        np.testing.assert_allclose(np.asarray(out), np.asarray(ref),
                                   rtol=3e-2, atol=3e-2)
        assert out.shape == (n, 1)

    print("KERNEL_OK")
</pallas_src>

<mosaic_0001>
module attributes {stable_mosaic.version = 11 : i64} {
  func.func @cond_a2b_kernel(%arg0: i32, %arg1: memref<8x128xf32, #tpu.memory_space<vmem>>, %arg2: memref<8x128xf32, #tpu.memory_space<vmem>>, %arg3: memref<256x256xbf16, #tpu.memory_space<vmem>>, %arg4: memref<8x8x32xf32, #tpu.memory_space<vmem>>, %arg5: memref<8x128xf32, #tpu.memory_space<vmem>>) attributes {dimension_semantics = [#tpu.dimension_semantics<parallel>], iteration_bounds = array<i64: 1>, scalar_prefetch = 0 : i64, scratch_operands = 0 : i64, tpu.core_type = #tpu.core_type<tc>, window_params = [{transform_indices = @transform_0, window_bounds = array<i64: 8, 128>}, {transform_indices = @transform_1, window_bounds = array<i64: 8, 128>}, {pipeline_mode = #tpu.pipeline_mode<synchronous>, transform_indices = @transform_2, window_bounds = array<i64: 256, 256>}, {pipeline_mode = #tpu.pipeline_mode<synchronous>, transform_indices = @transform_3, window_bounds = array<i64: 8, 8, 32>}, {transform_indices = @transform_4, window_bounds = array<i64: 8, 128>}]} {
    %c0 = arith.constant 0 : index
    %c0_0 = arith.constant 0 : index
    %0 = vector.load %arg1[%c0, %c0_0] : memref<8x128xf32, #tpu.memory_space<vmem>>, vector<8x128xf32>
    %1 = vector.shape_cast %0 : vector<8x128xf32> to vector<8x1x128xf32>
    %c0_1 = arith.constant 0 : index
    %c0_2 = arith.constant 0 : index
    %2 = vector.load %arg2[%c0_1, %c0_2] : memref<8x128xf32, #tpu.memory_space<vmem>>, vector<8x128xf32>
    %c0_3 = arith.constant 0 : index
    %c0_4 = arith.constant 0 : index
    %c0_5 = arith.constant 0 : index
    %3 = vector.load %arg4[%c0_3, %c0_4, %c0_5] : memref<8x8x32xf32, #tpu.memory_space<vmem>>, vector<8x8x32xf32>
    %4 = vector.extract_strided_slice %3 {offsets = [0, 0, 0], sizes = [1, 8, 32], strides = [1, 1, 1]} : vector<8x8x32xf32> to vector<1x8x32xf32>
    %5 = vector.shape_cast %4 : vector<1x8x32xf32> to vector<8x32xf32>
    %6 = vector.shape_cast %5 : vector<8x32xf32> to vector<8x32x1xf32>
    %7 = vector.extract_strided_slice %3 {offsets = [1, 0, 0], sizes = [1, 8, 32], strides = [1, 1, 1]} : vector<8x8x32xf32> to vector<1x8x32xf32>
    %8 = vector.shape_cast %7 : vector<1x8x32xf32> to vector<8x32xf32>
    %9 = vector.shape_cast %8 : vector<8x32xf32> to vector<8x32x1xf32>
    %10 = vector.extract_strided_slice %3 {offsets = [2, 0, 0], sizes = [1, 8, 32], strides = [1, 1, 1]} : vector<8x8x32xf32> to vector<1x8x32xf32>
    %11 = vector.shape_cast %10 : vector<1x8x32xf32> to vector<8x32xf32>
    %12 = vector.shape_cast %11 : vector<8x32xf32> to vector<8x32x1xf32>
    %13 = vector.extract_strided_slice %3 {offsets = [3, 0, 0], sizes = [1, 8, 32], strides = [1, 1, 1]} : vector<8x8x32xf32> to vector<1x8x32xf32>
    %14 = vector.shape_cast %13 : vector<1x8x32xf32> to vector<8x32xf32>
    %15 = vector.shape_cast %14 : vector<8x32xf32> to vector<8x32x1xf32>
    %16 = vector.extract_strided_slice %3 {offsets = [4, 0, 0], sizes = [1, 8, 32], strides = [1, 1, 1]} : vector<8x8x32xf32> to vector<1x8x32xf32>
    %17 = vector.shape_cast %16 : vector<1x8x32xf32> to vector<8x32xf32>
    %18 = vector.shape_cast %17 : vector<8x32xf32> to vector<8x32x1xf32>
    %19 = vector.extract_strided_slice %3 {offsets = [5, 0, 0], sizes = [1, 8, 32], strides = [1, 1, 1]} : vector<8x8x32xf32> to vector<1x8x32xf32>
    %20 = vector.shape_cast %19 : vector<1x8x32xf32> to vector<8x32xf32>
    %21 = vector.shape_cast %20 : vector<8x32xf32> to vector<8x32x1xf32>
    %22 = vector.extract_strided_slice %3 {offsets = [6, 0, 0], sizes = [1, 8, 32], strides = [1, 1, 1]} : vector<8x8x32xf32> to vector<1x8x32xf32>
    %23 = vector.shape_cast %22 : vector<1x8x32xf32> to vector<8x32xf32>
    %24 = vector.shape_cast %23 : vector<8x32xf32> to vector<8x32x1xf32>
    %25 = vector.broadcast %6 : vector<8x32x1xf32> to vector<8x32x128xf32>
    %26 = vector.broadcast %1 : vector<8x1x128xf32> to vector<8x32x128xf32>
    %27 = arith.mulf %25, %26 : vector<8x32x128xf32>
    %28 = vector.broadcast %9 : vector<8x32x1xf32> to vector<8x32x128xf32>
    %29 = arith.addf %27, %28 : vector<8x32x128xf32>
    %cst = arith.constant 0.000000e+00 : f32
    %30 = vector.broadcast %cst : f32 to vector<8x32x128xf32>
    %31 = arith.maximumf %29, %30 : vector<8x32x128xf32>
    %32 = vector.shape_cast %31 : vector<8x32x128xf32> to vector<256x128xf32>
    %33 = arith.truncf %32 : vector<256x128xf32> to vector<256x128xbf16>
    %c0_6 = arith.constant 0 : index
    %c0_7 = arith.constant 0 : index
    %34 = vector.load %arg3[%c0_6, %c0_7] : memref<256x256xbf16, #tpu.memory_space<vmem>>, vector<256x256xbf16>
    %cst_8 = arith.constant dense<0.000000e+00> : vector<256x128xf32>
    %35 = tpu.matmul %34, %33, %cst_8 {dimension_numbers = #tpu.dot_dimension_numbers<[1], [0], [0], [1], [0, 0, 1, 1], [], []>} : vector<256x256xbf16>, vector<256x128xbf16>, vector<256x128xf32> -> vector<256x128xf32>
    %36 = vector.shape_cast %35 : vector<256x128xf32> to vector<8x32x128xf32>
    %37 = vector.broadcast %12 : vector<8x32x1xf32> to vector<8x32x128xf32>
    %38 = arith.addf %36, %37 : vector<8x32x128xf32>
    %cst_9 = arith.constant 0.000000e+00 : f32
    %39 = vector.broadcast %cst_9 : f32 to vector<8x32x128xf32>
    %40 = arith.maximumf %38, %39 : vector<8x32x128xf32>
    %41 = vector.broadcast %15 : vector<8x32x1xf32> to vector<8x32x128xf32>
    %42 = arith.mulf %40, %41 : vector<8x32x128xf32>
    %43 = vector.broadcast %21 : vector<8x32x1xf32> to vector<8x32x128xf32>
    %44 = arith.addf %42, %43 : vector<8x32x128xf32>
    %cst_10 = arith.constant dense<0.000000e+00> : vector<8x128xf32>
    %45 = vector.multi_reduction <add>, %44, %cst_10 [1] : vector<8x32x128xf32> to vector<8x128xf32>
    %46 = vector.broadcast %18 : vector<8x32x1xf32> to vector<8x32x128xf32>
    %47 = arith.mulf %40, %46 : vector<8x32x128xf32>
    %48 = vector.broadcast %24 : vector<8x32x1xf32> to vector<8x32x128xf32>
    %49 = arith.addf %47, %48 : vector<8x32x128xf32>
    %cst_11 = arith.constant dense<0.000000e+00> : vector<8x128xf32>
    %50 = vector.multi_reduction <add>, %49, %cst_11 [1] : vector<8x32x128xf32> to vector<8x128xf32>
    %51 = arith.subf %2, %45 : vector<8x128xf32>
    %cst_12 = arith.constant 1.83787704 : f32
    %52 = vector.broadcast %cst_12 : f32 to vector<8x128xf32>
    %53 = arith.addf %52, %50 : vector<8x128xf32>
    %54 = arith.mulf %51, %51 : vector<8x128xf32>
    %cst_13 = arith.constant 0.000000e+00 : f32
    %55 = vector.broadcast %cst_13 : f32 to vector<8x128xf32>
    %56 = arith.subf %55, %50 : vector<8x128xf32>
    %57 = math.exp %56 : vector<8x128xf32>
    %58 = arith.mulf %54, %57 : vector<8x128xf32>
    %59 = arith.addf %53, %58 : vector<8x128xf32>
    %cst_14 = arith.constant -5.000000e-01 : f32
    %60 = vector.broadcast %cst_14 : f32 to vector<8x128xf32>
    %61 = arith.mulf %60, %59 : vector<8x128xf32>
    %c0_15 = arith.constant 0 : index
    %c0_16 = arith.constant 0 : index
    %62 = vector.load %arg5[%c0_15, %c0_16] : memref<8x128xf32, #tpu.memory_space<vmem>>, vector<8x128xf32>
    tpu.vector_store %arg5[%c0_15, %c0_16], %61 {strides = array<i32>} : memref<8x128xf32, #tpu.memory_space<vmem>>, vector<8x128xf32>,
    return
  }
  func.func @transform_0(%arg0: i32) -> (i32, i32) {
    %c0_i32 = arith.constant 0 : i32
    %c0_i32_0 = arith.constant 0 : i32
    return %c0_i32, %arg0 : i32, i32
  }
  func.func @transform_1(%arg0: i32) -> (i32, i32) {
    %c0_i32 = arith.constant 0 : i32
    %c0_i32_0 = arith.constant 0 : i32
    return %c0_i32, %arg0 : i32, i32
  }
  func.func @transform_2(%arg0: i32) -> (i32, i32) {
    %c0_i32 = arith.constant 0 : i32
    %c0_i32_0 = arith.constant 0 : i32
    %c0_i32_1 = arith.constant 0 : i32
    return %c0_i32, %c0_i32_0 : i32, i32
  }
  func.func @transform_3(%arg0: i32) -> (i32, i32, i32) {
    %c0_i32 = arith.constant 0 : i32
    %c0_i32_0 = arith.constant 0 : i32
    %c0_i32_1 = arith.constant 0 : i32
    %c0_i32_2 = arith.constant 0 : i32
    return %c0_i32, %c0_i32_0, %c0_i32_1 : i32, i32, i32
  }
  func.func @transform_4(%arg0: i32) -> (i32, i32) {
    %c0_i32 = arith.constant 0 : i32
    %c0_i32_0 = arith.constant 0 : i32
    return %c0_i32, %arg0 : i32, i32
  }
}

</mosaic_0001>

<bundles_post_ra>
// kernel: tpu_custom_call.1
= control target key start
LH: loop header
LB: loop body
LE: loop exit
PB: predicated region body
PF: predicated region fallthrough
CT: control target
= control target key end

     0   :  { %9 = vsyncpa [#allocation3], 0  ;;  %s3465_s0 = inlined_call_operand.hbm [shape: f32[8,128], index: 0, kind: input, shape index: {}]   ;;  %s3466_s1 = inlined_call_operand.hbm [shape: f32[8,128], index: 1, kind: input, shape index: {}]   ;;  %s3467_s2 = inlined_call_operand.hbm [shape: bf16[256,256], index: 2, kind: input, shape index: {}]   ;;  %s3468_s3 = inlined_call_operand.hbm [shape: f32[8,8,32], index: 3, kind: input, shape index: {}]   ;;  %s3469_s4 = inlined_call_operand.hbm [shape: f32[8,128], index: 4, kind: output, shape index: {}]  }
   0x1   :  { %10 = vsyncpa [#allocation6], 0 }
   0x2   :  { %11 = vsyncpa [#allocation9], 0 }
   0x3   :  { %12 = vsyncpa [#allocation4], 0  ;;  %s2532_s15 = smov [#allocation5]   ;;  %s2533_s17 = smov [#allocation2]  }
   0x4   :  { %s29_s16 = sshll.u32 %s2532_s15, 4  ;;  %s19_s18 = sshll.u32 %s2533_s17, 4  ;;  %s30_s16 = int_to_ptr.vmem [resolvable:$true] %s29_s16  ;;  %s20_s18 = int_to_ptr.vmem [resolvable:$true] %s19_s18 }
   0x5   :  { %s2414_s21 = scalar_lea.hbm %s3466_s1, 128 }
   0x6   :  { %p2415_p0 = scmp.ne.s32.totalorder %s3466_s1, %s2414_s21  ;;  %p2418_p1 = scmp.lt.u32.totalorder %s2414_s21, %s3466_s1 }
   0x8   :  { %p2420_p2 = pnand %p2418_p1, %p2415_p0 }
   0xa   :  { %2423 = shalt.err (!%p2420_p2)
}
   0xb   :  { %s2424_s26 = scalar_lea.vmem %s30_s16, 128  ;;  %p2429_p4 = scmp.lt.s32.totalorder %s30_s16, %s30_s16 }
   0xc   :  { %p2425_p3 = scmp.ne.s32.totalorder %s30_s16, %s2424_s26  ;;  %p2430_p5 = scmp.lt.s32.totalorder %s2424_s26, %s2424_s26 }
   0xe   :  { %p2431_p6 = por %p2430_p5, %p2429_p4 }
  0x10   :  { %p2432_p7 = pnand %p2431_p6, %p2425_p3 }
  0x12   :  { %2435 = shalt.err (!%p2432_p7)
}
  0x13   :  { %32 = dma.hbm_to_vmem [thread:$0]  %s3466_s1, 128, %s30_s16, [#allocation6]  }
  0x14   :  { %s2436_s5 = scalar_lea.hbm %s3465_s0, 128 }
  0x15   :  { %p2437_p8 = scmp.ne.s32.totalorder %s3465_s0, %s2436_s5  ;;  %p2440_p9 = scmp.lt.u32.totalorder %s2436_s5, %s3465_s0 }
  0x17   :  { %p2442_p10 = pnand %p2440_p9, %p2437_p8 }
  0x19   :  { %2445 = shalt.err (!%p2442_p10)
}
  0x1a   :  { %s2446_s10 = scalar_lea.vmem %s20_s18, 128  ;;  %p2451_p12 = scmp.lt.s32.totalorder %s20_s18, %s20_s18 }
  0x1b   :  { %p2447_p11 = scmp.ne.s32.totalorder %s20_s18, %s2446_s10  ;;  %p2452_p13 = scmp.lt.s32.totalorder %s2446_s10, %s2446_s10 }
  0x1d   :  { %p2453_p0 = por %p2452_p13, %p2451_p12 }
  0x1f   :  { %p2454_p1 = pnand %p2453_p0, %p2447_p11 }
  0x21   :  { %2457 = shalt.err (!%p2454_p1)
}
  0x22   :  { %22 = dma.hbm_to_vmem [thread:$0]  %s3465_s0, 128, %s20_s18, [#allocation3]  }
  0x23   :  { %s2534_s12 = smov [#allocation7]   ;;  %s2458_s16 = scalar_lea.hbm %s3467_s2, 4096 }
  0x24   :  { %s38_s13 = sshll.u32 %s2534_s12, 4  ;;  %p2459_p2 = scmp.ne.s32.totalorder %s3467_s2, %s2458_s16  ;;  %s39_s13 = int_to_ptr.vmem [resolvable:$true] %s38_s13 }
  0x25   :  { %p2462_p3 = scmp.lt.u32.totalorder %s2458_s16, %s3467_s2 }
  0x27   :  { %p2464_p4 = pnand %p2462_p3, %p2459_p2 }
  0x29   :  { %2467 = shalt.err (!%p2464_p4)
}
  0x2a   :  { %s2468_s22 = scalar_lea.vmem %s39_s13, 4096  ;;  %p2473_p6 = scmp.lt.s32.totalorder %s39_s13, %s39_s13 }
  0x2b   :  { %p2469_p5 = scmp.ne.s32.totalorder %s39_s13, %s2468_s22  ;;  %p2474_p7 = scmp.lt.s32.totalorder %s2468_s22, %s2468_s22 }
  0x2d   :  { %p2475_p8 = por %p2474_p7, %p2473_p6 }
  0x2f   :  { %p2476_p9 = pnand %p2475_p8, %p2469_p5 }
  0x31   :  { %2479 = shalt.err (!%p2476_p9)
}
  0x32   :  { %s2535_s0 = smov 128   ;;  %s2536_s18 = smov 8  }
  0x33   :  { %44 = dma.hbm_to_vmem [thread:$0]  %s3467_s2, 4096, %s39_s13, [#allocation6], %s2535_s0, %s2535_s0, %s2536_s18  }
  0x34   :  { %s2537_s25 = smov [#allocation8]   ;;  %s2480_s29 = scalar_lea.hbm %s3468_s3, 1024 }
  0x35   :  { %s50_s26 = sshll.u32 %s2537_s25, 4  ;;  %p2481_p10 = scmp.ne.s32.totalorder %s3468_s3, %s2480_s29  ;;  %s51_s26 = int_to_ptr.vmem [resolvable:$true] %s50_s26 }
  0x36   :  { %p2484_p11 = scmp.lt.u32.totalorder %s2480_s29, %s3468_s3 }
  0x38   :  { %p2486_p12 = pnand %p2484_p11, %p2481_p10 }
  0x3a   :  { %2489 = shalt.err (!%p2486_p12)
}
  0x3b   :  { %s2490_s8 = scalar_lea.vmem %s51_s26, 1024  ;;  %p2495_p0 = scmp.lt.s32.totalorder %s51_s26, %s51_s26 }
  0x3c   :  { %p2491_p13 = scmp.ne.s32.totalorder %s51_s26, %s2490_s8  ;;  %p2496_p1 = scmp.lt.s32.totalorder %s2490_s8, %s2490_s8 }
  0x3e   :  { %p2497_p2 = por %p2496_p1, %p2495_p0 }
  0x40   :  { %p2498_p3 = pnand %p2497_p2, %p2491_p13 }
  0x42   :  { %2501 = shalt.err (!%p2498_p3)
}
  0x43   :  { %56 = dma.hbm_to_vmem [thread:$0]  %s3468_s3, 1024, %s51_s26, [#allocation9], %s2535_s0, %s2535_s0, %s2536_s18  }
  0x44   :  { %2524 = dma.done.wait [#allocation3], 128  }
  0x45   :  { %2525 = vsyncadd [#allocation3], 4294967168 }
  0x46   :  { %2526 = dma.done.wait [#allocation6], 4224  }
  0x47   :  { %2527 = vsyncadd [#allocation6], 4294963072 }
  0x48   :  { %2528 = dma.done.wait [#allocation9], 1024  }
  0x49   :  { %2529 = vsyncadd [#allocation9], 4294966272  ;;  %v76_v0 = vlaneseq  ;;  %v2618_v3 = vld [vmem:[#allocation8] sm:$0xff]  ;;  %v123_v11 = vld [vmem:[#allocation8 + $0x8] sm:$0xff]  ;;  %v2538_v28 = vmov 1966171168  }
  0x4a   :  { %v74_v29 = vunpack.c.l.s4 %v2538_v28  ;;  %v70_v33 = vld [vmem:[#allocation2] sm:$0xff]  ;;  %v2352_v35 = vld [vmem:[#allocation7 + $0x4] ss:$8 sps:$4 sm:$0xff]   ;;  %vm2042_vm0 = vcmask 1041409   ;;  %vm2044_vm1 = vcmask 1042434   ;;  %vm2046_vm2 = vcmask 1043459  }
  0x4b   :  { %v2613_v1 = vshrl.u32 %v76_v0, 7  ;;  %v72_v34 = vcombine.high %v70_v33, %v70_v33  ;;  %v2355_v36 = vld [vmem:[#allocation7 + $0x84] ss:$8 sps:$4 sm:$0xff]   ;;  %1569 = vmatprep.mubr.bf16.mxu0 %v2352_v35  ;;  %v2672_v40 = vld [vmem:[#allocation8 + $0x10] sm:$0xff]  ;;  %vm2048_vm3 = vcmask 1044484   ;;  %vm2050_vm4 = vcmask 1045509  }
  0x4c   :  { %v75_v32 = vunpack.c.0.s8 %v74_v29  ;;  %1633 = vmatprep.mubr.bf16.mxu1 %v2355_v36  ;;  %vm2052_vm5 = vcmask 1046534   ;;  %vm2054_vm6 = vcmask 1047559   ;;  %s2539_s3 = smov [#allocation10]  }
  0x4d   :  { %v2616_v2 = vsub.s32 0, %v2613_v1  ;;  %v2623_v5 = vsub.s32 1, %v2613_v1  ;;  %v2628_v7 = vsub.s32 4, %v2613_v1  ;;  %v2631_v8 = vsub.s32 2, %v2613_v1  ;;  %s2170_s10 = sshll.u32 %s2539_s3, 4  ;;  %s2171_s10 = int_to_ptr.vmem [resolvable:$true] %s2170_s10 }
  0x4e   :  { %v2640_v14 = vsub.s32 5, %v2613_v1  ;;  %v2647_v18 = vsub.s32 6, %v2613_v1  ;;  %v2654_v22 = vsub.s32 7, %v2613_v1  ;;  %v2659_v24 = vsub.s32 3, %v2613_v1  ;;  %s2502_s1 = scalar_lea.vmem %s2171_s10, 128  ;;  %p2507_p5 = scmp.lt.s32.totalorder %s2171_s10, %s2171_s10 }
  0x4f   :  { %v132_v4 = vrot.slane %v2618_v3, %v2616_v2  ;;  %v151_v6 = vrot.slane %v2618_v3, %v2623_v5  ;;  %v208_v9 = vrot.slane %v2618_v3, %v2628_v7  ;;  %v170_v10 = vrot.slane %v2618_v3, %v2631_v8  ;;  %p2503_p4 = scmp.ne.s32.totalorder %s2171_s10, %s2502_s1  ;;  %p2508_p6 = scmp.lt.s32.totalorder %s2502_s1, %s2502_s1 }
  0x50   :  { %v360_v12 = vrot.slane %v123_v11, %v2628_v7  ;;  %v284_v13 = vrot.slane %v123_v11, %v2616_v2  ;;  %v227_v15 = vrot.slane %v2618_v3, %v2640_v14  ;;  %v379_v16 = vrot.slane %v123_v11, %v2640_v14 }
  0x51   :  { %142 = vbcast.lane.b32.xlu1 %v132_v4, 272  ;;  %134 = vbcast.lane.b32.xlu0 %v132_v4, 256  ;;  %v303_v17 = vrot.slane %v123_v11, %v2623_v5  ;;  %v246_v19 = vrot.slane %v2618_v3, %v2647_v18  ;;  %v398_v20 = vrot.slane %v123_v11, %v2647_v18  ;;  %p2509_p7 = por %p2508_p6, %p2507_p5 }
  0x52   :  { %v322_v21 = vrot.slane %v123_v11, %v2631_v8  ;;  %v265_v23 = vrot.slane %v2618_v3, %v2654_v22  ;;  %v189_v25 = vrot.slane %v2618_v3, %v2659_v24  ;;  %v417_v26 = vrot.slane %v123_v11, %v2654_v22 }
  0x53   :  { %v341_v27 = vrot.slane %v123_v11, %v2659_v24  ;;  %v2670_v39 = vsub.s32 %v75_v32, %v2613_v1  ;;  %v436_v44 = vrot.slane %v2672_v40, %v2616_v2  ;;  %v455_v53 = vrot.slane %v2672_v40, %v2623_v5  ;;  %p2510_p8 = pnand %p2509_p7, %p2503_p4 }
  0x54   :  { %v474_v0 = vrot.slane %v2672_v40, %v2631_v8 }
  0x55   :  { %146 = vbcast.lane.b32.xlu1 %v132_v4, 280  ;;  %138 = vbcast.lane.b32.xlu0 %v132_v4, 264  ;;  %v86_v41 = vrot.slane %v72_v34, %v2670_v39  ;;  %v2689_v48 = vrot.slane %v70_v33, %v2670_v39 }
  0x57   :  { %v2682_v45 = vrot.slane %v86_v41, %v2670_v39  ;;  %v2697_v52 = vrot.slane %v2689_v48, %v2670_v39  ;;  %v87_v32 = vcombine.high %v2689_v48, %v2689_v48  ;;  %v512_v48 = vrot.slane %v2672_v40, %v2628_v7 }
  0x59   :  { %157 = vbcast.lane.b32.xlu1 %v151_v6, 264  ;;  %153 = vbcast.lane.b32.xlu0 %v151_v6, 256  ;;  %v1212_v49 = vrot.slane %v2682_v45, %v2616_v2  ;;  %v1196_v57 = vrot.slane %v2697_v52, %v2616_v2 }
  0x5d   :  { %165 = vbcast.lane.b32.xlu1 %v151_v6, 280  ;;  %161 = vbcast.lane.b32.xlu0 %v151_v6, 272 }
  0x61   :  { %210 = vbcast.lane.b32.xlu1 %v208_v9, 256  ;;  %172 = vbcast.lane.b32.xlu0 %v170_v10, 256 }
  0x65   :  { %362 = vbcast.lane.b32.xlu1 %v360_v12, 256  ;;  %214 = vbcast.lane.b32.xlu0 %v208_v9, 264 }
  0x69   :  { %286 = vbcast.lane.b32.xlu1 %v284_v13, 256  ;;  %366 = vbcast.lane.b32.xlu0 %v360_v12, 264 }
  0x6d   :  { %218 = vbcast.lane.b32.xlu1 %v208_v9, 272  ;;  %290 = vbcast.lane.b32.xlu0 %v284_v13, 264 }
  0x71   :  { %370 = vbcast.lane.b32.xlu1 %v360_v12, 272  ;;  %222 = vbcast.lane.b32.xlu0 %v208_v9, 280 }
  0x75   :  { %294 = vbcast.lane.b32.xlu1 %v284_v13, 272  ;;  %374 = vbcast.lane.b32.xlu0 %v360_v12, 280 }
  0x79   :  { %229 = vbcast.lane.b32.xlu1 %v227_v15, 256  ;;  %298 = vbcast.lane.b32.xlu0 %v284_v13, 280  ;;  %v88_v13 = vcombine.high %v86_v41, %v86_v41 }
  0x7d   :  { %381 = vbcast.lane.b32.xlu1 %v379_v16, 256  ;;  %233 = vbcast.lane.b32.xlu0 %v227_v15, 264 }
  0x81   :  { %305 = vbcast.lane.b32.xlu1 %v303_v17, 256  ;;  %385 = vbcast.lane.b32.xlu0 %v379_v16, 264 }
  0x85   :  { %237 = vbcast.lane.b32.xlu1 %v227_v15, 272  ;;  %309 = vbcast.lane.b32.xlu0 %v303_v17, 264 }
  0x89   :  { %389 = vbcast.lane.b32.xlu1 %v379_v16, 272  ;;  %241 = vbcast.lane.b32.xlu0 %v227_v15, 280 }
  0x8d   :  { %313 = vbcast.lane.b32.xlu1 %v303_v17, 272  ;;  %393 = vbcast.lane.b32.xlu0 %v379_v16, 280 }
  0x91   :  { %248 = vbcast.lane.b32.xlu1 %v246_v19, 256  ;;  %317 = vbcast.lane.b32.xlu0 %v303_v17, 280 }
  0x95   :  { %176 = vbcast.lane.b32.xlu1 %v170_v10, 264  ;;  %252 = vbcast.lane.b32.xlu0 %v246_v19, 264 }
  0x99   :  { %404 = vbcast.lane.b32.xlu1 %v398_v20, 264  ;;  %400 = vbcast.lane.b32.xlu0 %v398_v20, 256 }
  0x9d   :  { %328 = vbcast.lane.b32.xlu1 %v322_v21, 264  ;;  %324 = vbcast.lane.b32.xlu0 %v322_v21, 256 }
  0xa1   :  { %260 = vbcast.lane.b32.xlu1 %v246_v19, 280  ;;  %256 = vbcast.lane.b32.xlu0 %v246_v19, 272 }
  0xa5   :  { %184 = vbcast.lane.b32.xlu1 %v170_v10, 280  ;;  %180 = vbcast.lane.b32.xlu0 %v170_v10, 272 }
  0xa9   :  { %412 = vbcast.lane.b32.xlu1 %v398_v20, 280  ;;  %408 = vbcast.lane.b32.xlu0 %v398_v20, 272 }
  0xad   :  { %336 = vbcast.lane.b32.xlu1 %v322_v21, 280  ;;  %332 = vbcast.lane.b32.xlu0 %v322_v21, 272 }
  0xb1   :  { %271 = vbcast.lane.b32.xlu1 %v265_v23, 264  ;;  %267 = vbcast.lane.b32.xlu0 %v265_v23, 256 }
  0xb5   :  { %195 = vbcast.lane.b32.xlu1 %v189_v25, 264  ;;  %191 = vbcast.lane.b32.xlu0 %v189_v25, 256 }
  0xb9   :  { %423 = vbcast.lane.b32.xlu1 %v417_v26, 264  ;;  %419 = vbcast.lane.b32.xlu0 %v417_v26, 256 }
  0xbd   :  { %347 = vbcast.lane.b32.xlu1 %v341_v27, 264  ;;  %343 = vbcast.lane.b32.xlu0 %v341_v27, 256 }
  0xc1   :  { %279 = vbcast.lane.b32.xlu1 %v265_v23, 280  ;;  %275 = vbcast.lane.b32.xlu0 %v265_v23, 272  ;;  %v493_v23 = vrot.slane %v2672_v40, %v2659_v24 }
  0xc3   :  { %v2665_v30 = vpop.permute.xlu1 %142  ;;  %v135_v31 = vpop.permute.xlu0 %134 }
  0xc4   :  { %v1233_v62 = vmul.f32 %v1196_v57, %v135_v31  ;;  %v1235_v31 = vmul.f32 %v1196_v57, %v2665_v30 }
  0xc5   :  { %203 = vbcast.lane.b32.xlu1 %v189_v25, 280  ;;  %199 = vbcast.lane.b32.xlu0 %v189_v25, 272  ;;  %v2708_v25 = vrot.slane %v88_v13, %v2670_v39 }
  0xc7   :  { %v2667_v37 = vpop.permute.xlu1 %146  ;;  %v139_v38 = vpop.permute.xlu0 %138  ;;  %v1216_v34 = vrot.slane %v2708_v25, %v2616_v2 }
  0xc8   :  { %v1234_v1 = vmul.f32 %v1196_v57, %v139_v38  ;;  %v1236_v35 = vmul.f32 %v1196_v57, %v2667_v37 }
  0xc9   :  { %431 = vbcast.lane.b32.xlu1 %v417_v26, 280  ;;  %427 = vbcast.lane.b32.xlu0 %v417_v26, 272 }
  0xcb   :  { %v2675_v42 = vpop.permute.xlu1 %157  ;;  %v2677_v43 = vpop.permute.xlu0 %153 }
  0xcd   :  { %355 = vbcast.lane.b32.xlu1 %v341_v27, 280  ;;  %351 = vbcast.lane.b32.xlu0 %v341_v27, 272 }
  0xcf   :  { %v2684_v46 = vpop.permute.xlu1 %165  ;;  %v2686_v47 = vpop.permute.xlu0 %161 }
  0xd1   :  { %442 = vbcast.lane.b32.xlu1 %v436_v44, 264  ;;  %438 = vbcast.lane.b32.xlu0 %v436_v44, 256 }
  0xd3   :  { %v211_v50 = vpop.permute.xlu1 %210  ;;  %v2693_v51 = vpop.permute.xlu0 %172 }
  0xd4   :  { %v1249_v54 = vmul.f32 %v1212_v49, %v211_v50  ;;  %v2717_v50 = vrot.slane %v87_v32, %v2670_v39 }
  0xd5   :  { %450 = vbcast.lane.b32.xlu1 %v436_v44, 280  ;;  %446 = vbcast.lane.b32.xlu0 %v436_v44, 272 }
  0xd7   :  { %v363_v55 = vpop.permute.xlu1 %362  ;;  %v215_v56 = vpop.permute.xlu0 %214 }
  0xd8   :  { %v1281_v58 = vadd.f32 %v1249_v54, %v363_v55  ;;  %v1250_v59 = vmul.f32 %v1212_v49, %v215_v56 }
  0xd9   :  { %461 = vbcast.lane.b32.xlu1 %v455_v53, 264  ;;  %457 = vbcast.lane.b32.xlu0 %v455_v53, 256 }
  0xda   :  { %v1313_v3 = vmax.f32 %v1281_v58, 0.0  ;;  %v1200_v58 = vrot.slane %v2717_v50, %v2616_v2 }
  0xdb   :  { %v287_v60 = vpop.permute.xlu1 %286  ;;  %v367_v61 = vpop.permute.xlu0 %366 }
  0xdc   :  { %v1282_v63 = vadd.f32 %v1250_v59, %v367_v61  ;;  %v1265_v4 = vadd.f32 %v1233_v62, %v287_v60  ;;  %v1240_v32 = vmul.f32 %v1200_v58, %v2684_v46 }
  0xdd   :  { %469 = vbcast.lane.b32.xlu1 %v455_v53, 280  ;;  %465 = vbcast.lane.b32.xlu0 %v455_v53, 272 }
  0xde   :  { %v1314_v6 = vmax.f32 %v1282_v63, 0.0  ;;  %v1297_v15 = vmax.f32 %v1265_v4, 0.0  ;;  %v1237_v63 = vmul.f32 %v1200_v58, %v2677_v43 }
  0xdf   :  { %v219_v9 = vpop.permute.xlu1 %218  ;;  %v291_v10 = vpop.permute.xlu0 %290 }
  0xe0   :  { %v1266_v11 = vadd.f32 %v1234_v1, %v291_v10  ;;  %v1337_v12 = vpack.c.bf16 %v1314_v6, %v1313_v3  ;;  %v1251_v16 = vmul.f32 %v1212_v49, %v219_v9  ;;  %v531_v1 = vrot.slane %v2672_v40, %v2640_v14 }
  0xe1   :  { %480 = vbcast.lane.b32.xlu1 %v474_v0, 264  ;;  %476 = vbcast.lane.b32.xlu0 %v474_v0, 256  ;;  %v1238_v3 = vmul.f32 %v1200_v58, %v2675_v42  ;;  %v550_v42 = vrot.slane %v2672_v40, %v2647_v18 }
  0xe2   :  { %v1298_v17 = vmax.f32 %v1266_v11, 0.0  ;;  %2213 = vmatprep.subr.bf16.mxu0 %v1337_v12  ;;  %2325 = vmatprep.subr.bf16.mxu1 %v1337_v12 }
  0xe3   :  { %v371_v19 = vpop.permute.xlu1 %370  ;;  %v223_v20 = vpop.permute.xlu0 %222 }
  0xe4   :  { %v1329_v21 = vpack.c.bf16 %v1298_v17, %v1297_v15  ;;  %v1283_v26 = vadd.f32 %v1251_v16, %v371_v19  ;;  %v1252_v27 = vmul.f32 %v1212_v49, %v223_v20 }
  0xe5   :  { %488 = vbcast.lane.b32.xlu1 %v474_v0, 280  ;;  %484 = vbcast.lane.b32.xlu0 %v474_v0, 272 }
  0xe6   :  { %2214 = vmatpush3.bf16.msra.mxu0 %v1329_v21  ;;  %2333 = vmatpush3.bf16.msra.mxu1 %v1329_v21  ;;  %v1315_v36 = vmax.f32 %v1283_v26, 0.0 }
  0xe7   :  { %v295_v28 = vpop.permute.xlu1 %294  ;;  %v375_v29 = vpop.permute.xlu0 %374 }
  0xe8   :  { %v1284_v33 = vadd.f32 %v1252_v27, %v375_v29  ;;  %v1267_v38 = vadd.f32 %v1235_v31, %v295_v28  ;;  %v1239_v28 = vmul.f32 %v1200_v58, %v2686_v47  ;;  %v118_v31 = vcombine.high %v2682_v45, %v2682_v45 }
  0xe9   :  { %499 = vbcast.lane.b32.xlu1 %v493_v23, 264  ;;  %495 = vbcast.lane.b32.xlu0 %v493_v23, 256  ;;  %v569_v47 = vrot.slane %v2672_v40, %v2654_v22  ;;  %v2739_v40 = vld [vmem:[#allocation8 + $0x18] sm:$0xff] }
  0xea   :  { %v1316_v41 = vmax.f32 %v1284_v33, 0.0  ;;  %v1299_v54 = vmax.f32 %v1267_v38, 0.0  ;;  %v1220_v45 = vrot.slane %v118_v31, %v2616_v2 }
  0xeb   :  { %v230_v44 = vpop.permute.xlu1 %229  ;;  %v299_v49 = vpop.permute.xlu0 %298 }
  0xec   :  { %v1268_v30 = vadd.f32 %v1236_v35, %v299_v49  ;;  %v1338_v53 = vpack.c.bf16 %v1316_v41, %v1315_v36  ;;  %v1253_v55 = vmul.f32 %v1216_v34, %v230_v44  ;;  %v117_v49 = vcombine.high %v2697_v52, %v2697_v52 }
  0xed   :  { %507 = vbcast.lane.b32.xlu1 %v493_v23, 280  ;;  %503 = vbcast.lane.b32.xlu0 %v493_v23, 272 }
  0xee   :  { %v1300_v56 = vmax.f32 %v1268_v30, 0.0  ;;  %2215 = vmatprep.subr.bf16.mxu0 %v1338_v53  ;;  %2326 = vmatprep.subr.bf16.mxu1 %v1338_v53 }
  0xef   :  { %v382_v37 = vpop.permute.xlu1 %381  ;;  %v234_v57 = vpop.permute.xlu0 %233 }
  0xf0   :  { %v1330_v59 = vpack.c.bf16 %v1300_v56, %v1299_v54  ;;  %v1285_v39 = vadd.f32 %v1253_v55, %v382_v37  ;;  %v1254_v60 = vmul.f32 %v1216_v34, %v234_v57  ;;  %v1204_v55 = vrot.slane %v117_v49, %v2616_v2 }
  0xf1   :  { %518 = vbcast.lane.b32.xlu1 %v512_v48, 264  ;;  %514 = vbcast.lane.b32.xlu0 %v512_v48, 256 }
  0xf2   :  { %2216 = vmatpush3.bf16.msra.mxu0 %v1330_v59  ;;  %2334 = vmatpush3.bf16.msra.mxu1 %v1330_v59  ;;  %v1317_v4 = vmax.f32 %v1285_v39, 0.0  ;;  %v588_v39 = vrot.slane %v2739_v40, %v2616_v2 }
  0xf3   :  { %v306_v61 = vpop.permute.xlu1 %305  ;;  %v386_v62 = vpop.permute.xlu0 %385 }
  0xf4   :  { %v1286_v0 = vadd.f32 %v1254_v60, %v386_v62  ;;  %v1269_v6 = vadd.f32 %v1237_v63, %v306_v61  ;;  %v1241_v60 = vmul.f32 %v1204_v55, %v2693_v51  ;;  %v607_v51 = vrot.slane %v2739_v40, %v2623_v5 }
  0xf5   :  { %526 = vbcast.lane.b32.xlu1 %v512_v48, 280  ;;  %522 = vbcast.lane.b32.xlu0 %v512_v48, 272 }
  0xf6   :  { %v1318_v9 = vmax.f32 %v1286_v0, 0.0  ;;  %v1301_v15 = vmax.f32 %v1269_v6, 0.0 }
  0xf7   :  { %v238_v10 = vpop.permute.xlu1 %237  ;;  %v310_v11 = vpop.permute.xlu0 %309 }
  0xf8   :  { %v1270_v12 = vadd.f32 %v1238_v3, %v310_v11  ;;  %v1339_v13 = vpack.c.bf16 %v1318_v9, %v1317_v4  ;;  %v1255_v16 = vmul.f32 %v1216_v34, %v238_v10 }
  0xf9   :  { %537 = vbcast.lane.b32.xlu1 %v531_v1, 264  ;;  %533 = vbcast.lane.b32.xlu0 %v531_v1, 256 }
  0xfa   :  { %v1302_v43 = vmax.f32 %v1270_v12, 0.0  ;;  %2217 = vmatprep.subr.bf16.mxu0 %v1339_v13  ;;  %2327 = vmatprep.subr.bf16.mxu1 %v1339_v13 }
  0xfb   :  { %v390_v17 = vpop.permute.xlu1 %389  ;;  %v242_v19 = vpop.permute.xlu0 %241 }
  0xfc   :  { %v1331_v20 = vpack.c.bf16 %v1302_v43, %v1301_v15  ;;  %v1287_v21 = vadd.f32 %v1255_v16, %v390_v17  ;;  %v1256_v23 = vmul.f32 %v1216_v34, %v242_v19 }
  0xfd   :  { %545 = vbcast.lane.b32.xlu1 %v531_v1, 280  ;;  %541 = vbcast.lane.b32.xlu0 %v531_v1, 272 }
  0xfe   :  { %2218 = vmatpush3.bf16.msra.mxu0 %v1331_v20  ;;  %2335 = vmatpush3.bf16.msra.mxu1 %v1331_v20  ;;  %v1319_v33 = vmax.f32 %v1287_v21, 0.0 }
  0xff   :  { %v314_v26 = vpop.permute.xlu1 %313  ;;  %v394_v27 = vpop.permute.xlu0 %393 }
 0x100   :  { %v1288_v29 = vadd.f32 %v1256_v23, %v394_v27  ;;  %v1271_v35 = vadd.f32 %v1239_v28, %v314_v26  ;;  %v626_v23 = vrot.slane %v2739_v40, %v2631_v8 }
 0x101   :  { %556 = vbcast.lane.b32.xlu1 %v550_v42, 264  ;;  %552 = vbcast.lane.b32.xlu0 %v550_v42, 256 }
 0x102   :  { %v1320_v36 = vmax.f32 %v1288_v29, 0.0  ;;  %v1303_v30 = vmax.f32 %v1271_v35, 0.0 }
 0x103   :  { %v249_v38 = vpop.permute.xlu1 %248  ;;  %v318_v41 = vpop.permute.xlu0 %317 }
 0x104   :  { %v1272_v34 = vadd.f32 %v1240_v32, %v318_v41  ;;  %v1340_v44 = vpack.c.bf16 %v1320_v36, %v1319_v33  ;;  %v1257_v56 = vmul.f32 %v1220_v45, %v249_v38 }
 0x105   :  { %564 = vbcast.lane.b32.xlu1 %v550_v42, 280  ;;  %560 = vbcast.lane.b32.xlu0 %v550_v42, 272 }
 0x106   :  { %v1304_v53 = vmax.f32 %v1272_v34, 0.0  ;;  %2219 = vmatprep.subr.bf16.mxu0 %v1340_v44  ;;  %2328 = vmatprep.subr.bf16.mxu1 %v1340_v44  ;;  %v120_v34 = vcombine.high %v2708_v25, %v2708_v25 }
 0x107   :  { %v177_v46 = vpop.permute.xlu1 %176  ;;  %v253_v48 = vpop.permute.xlu0 %252 }
 0x108   :  { %v1332_v54 = vpack.c.bf16 %v1304_v53, %v1303_v30  ;;  %v1258_v37 = vmul.f32 %v1220_v45, %v253_v48  ;;  %v1242_v61 = vmul.f32 %v1204_v55, %v177_v46  ;;  %v645_v30 = vrot.slane %v2739_v40, %v2659_v24 }
 0x109   :  { %575 = vbcast.lane.b32.xlu1 %v569_v47, 264  ;;  %571 = vbcast.lane.b32.xlu0 %v569_v47, 256  ;;  %v119_v53 = vcombine.high %v2717_v50, %v2717_v50 }
 0x10a   :  { %2220 = vmatpush3.bf16.msra.mxu0 %v1332_v54  ;;  %2336 = vmatpush3.bf16.msra.mxu1 %v1332_v54 }
 0x10b   :  { %v405_v52 = vpop.permute.xlu1 %404  ;;  %v401_v57 = vpop.permute.xlu0 %400 }
 0x10c   :  { %v1290_v58 = vadd.f32 %v1258_v37, %v405_v52  ;;  %v1289_v59 = vadd.f32 %v1257_v56, %v401_v57 }
 0x10d   :  { %583 = vbcast.lane.b32.xlu1 %v569_v47, 280  ;;  %579 = vbcast.lane.b32.xlu0 %v569_v47, 272 }
 0x10e   :  { %v1322_v62 = vmax.f32 %v1290_v58, 0.0  ;;  %v1321_v63 = vmax.f32 %v1289_v59, 0.0  ;;  %v664_v58 = vrot.slane %v2739_v40, %v2628_v7 }
 0x10f   :  { %v329_v0 = vpop.permute.xlu1 %328  ;;  %v325_v1 = vpop.permute.xlu0 %324 }
 0x110   :  { %v1274_v3 = vadd.f32 %v1242_v61, %v329_v0  ;;  %v1273_v4 = vadd.f32 %v1241_v60, %v325_v1  ;;  %v1341_v6 = vpack.c.bf16 %v1322_v62, %v1321_v63 }
 0x111   :  { %594 = vbcast.lane.b32.xlu1 %v588_v39, 264  ;;  %590 = vbcast.lane.b32.xlu0 %v588_v39, 256 }
 0x112   :  { %v1306_v9 = vmax.f32 %v1274_v3, 0.0  ;;  %v1305_v10 = vmax.f32 %v1273_v4, 0.0  ;;  %2221 = vmatprep.subr.bf16.mxu0 %v1341_v6  ;;  %2329 = vmatprep.subr.bf16.mxu1 %v1341_v6 }
 0x113   :  { %v261_v11 = vpop.permute.xlu1 %260  ;;  %v257_v12 = vpop.permute.xlu0 %256 }
 0x114   :  { %v1333_v13 = vpack.c.bf16 %v1306_v9, %v1305_v10  ;;  %v1260_v43 = vmul.f32 %v1220_v45, %v261_v11  ;;  %v1259_v17 = vmul.f32 %v1220_v45, %v257_v12  ;;  %v1224_v45 = vrot.slane %v120_v34, %v2616_v2 }
 0x115   :  { %602 = vbcast.lane.b32.xlu1 %v588_v39, 280  ;;  %598 = vbcast.lane.b32.xlu0 %v588_v39, 272  ;;  %v683_v11 = vrot.slane %v2739_v40, %v2640_v14  ;;  %v721_v34 = vrot.slane %v2739_v40, %v2654_v22 }
 0x116   :  { %2222 = vmatpush3.bf16.msra.mxu0 %v1333_v13  ;;  %2337 = vmatpush3.bf16.msra.mxu1 %v1333_v13 }
 0x117   :  { %v185_v15 = vpop.permute.xlu1 %184  ;;  %v181_v16 = vpop.permute.xlu0 %180 }
 0x118   :  { %v1244_v26 = vmul.f32 %v1204_v55, %v185_v15  ;;  %v1243_v27 = vmul.f32 %v1204_v55, %v181_v16  ;;  %v1208_v55 = vrot.slane %v119_v53, %v2616_v2  ;;  %v2358_v53 = vld [vmem:[#allocation7 + $0x94] ss:$8 sps:$4 sm:$0xff]  }
 0x119   :  { %613 = vbcast.lane.b32.xlu1 %v607_v51, 264  ;;  %609 = vbcast.lane.b32.xlu0 %v607_v51, 256 }
 0x11b   :  { %v413_v19 = vpop.permute.xlu1 %412  ;;  %v409_v20 = vpop.permute.xlu0 %408 }
 0x11c   :  { %v1292_v42 = vadd.f32 %v1260_v43, %v413_v19  ;;  %v1291_v21 = vadd.f32 %v1259_v17, %v409_v20  ;;  %v702_v20 = vrot.slane %v2739_v40, %v2647_v18 }
 0x11d   :  { %621 = vbcast.lane.b32.xlu1 %v607_v51, 280  ;;  %617 = vbcast.lane.b32.xlu0 %v607_v51, 272 }
 0x11e   :  { %v1324_v28 = vmax.f32 %v1292_v42, 0.0  ;;  %v1323_v29 = vmax.f32 %v1291_v21, 0.0 }
 0x11f   :  { %v337_v31 = vpop.permute.xlu1 %336  ;;  %v333_v32 = vpop.permute.xlu0 %332 }
 0x120   :  { %v1276_v33 = vadd.f32 %v1244_v26, %v337_v31  ;;  %v1275_v35 = vadd.f32 %v1243_v27, %v333_v32  ;;  %v1342_v36 = vpack.c.bf16 %v1324_v28, %v1323_v29 }
 0x121   :  { %632 = vbcast.lane.b32.xlu1 %v626_v23, 264  ;;  %628 = vbcast.lane.b32.xlu0 %v626_v23, 256 }
 0x122   :  { %v1308_v38 = vmax.f32 %v1276_v33, 0.0  ;;  %v1307_v41 = vmax.f32 %v1275_v35, 0.0  ;;  %2223 = vmatprep.subr.bf16.mxu0 %v1342_v36  ;;  %2330 = vmatprep.subr.bf16.mxu1 %v1342_v36 }
 0x123   :  { %v272_v44 = vpop.permute.xlu1 %271  ;;  %v268_v47 = vpop.permute.xlu0 %267 }
 0x124   :  { %v1334_v49 = vpack.c.bf16 %v1308_v38, %v1307_v41  ;;  %v1262_v25 = vmul.f32 %v1224_v45, %v272_v44  ;;  %v1261_v54 = vmul.f32 %v1224_v45, %v268_v47  ;;  %v2350_v44 = vld [vmem:[#allocation7] ss:$8 sps:$4 sm:$0xff]  }
 0x125   :  { %640 = vbcast.lane.b32.xlu1 %v626_v23, 280  ;;  %636 = vbcast.lane.b32.xlu0 %v626_v23, 272  ;;  %v2353_v47 = vld [vmem:[#allocation7 + $0x80] ss:$8 sps:$4 sm:$0xff]  }
 0x126   :  { %2224 = vmatpush3.bf16.msra.mxu0 %v1334_v49  ;;  %2338 = vmatpush3.bf16.msra.mxu1 %v1334_v49 }
 0x127   :  { %v196_v46 = vpop.permute.xlu1 %195  ;;  %v192_v48 = vpop.permute.xlu0 %191 }
 0x128   :  { %v1246_v59 = vmul.f32 %v1208_v55, %v196_v46  ;;  %v1245_v39 = vmul.f32 %v1208_v55, %v192_v48  ;;  %v2772_v46 = vld [vmem:[#allocation8 + $0x20] sm:$0xff] }
 0x129   :  { %651 = vbcast.lane.b32.xlu1 %v645_v30, 264  ;;  %647 = vbcast.lane.b32.xlu0 %v645_v30, 256  ;;  %v740_v40 = vrot.slane %v2772_v46, %v2616_v2 }
 0x12b   :  { %v424_v56 = vpop.permute.xlu1 %423  ;;  %v420_v37 = vpop.permute.xlu0 %419 }
 0x12c   :  { %v1294_v52 = vadd.f32 %v1262_v25, %v424_v56  ;;  %v1293_v57 = vadd.f32 %v1261_v54, %v420_v37  ;;  %v2360_v54 = vld [vmem:[#allocation7 + $0x10] ss:$8 sps:$4 sm:$0xff]  }
 0x12d   :  { %659 = vbcast.lane.b32.xlu1 %v645_v30, 280  ;;  %655 = vbcast.lane.b32.xlu0 %v645_v30, 272 }
 0x12e   :  { %v1326_v50 = vmax.f32 %v1294_v52, 0.0  ;;  %v1325_v60 = vmax.f32 %v1293_v57, 0.0  ;;  %v2362_v52 = vld [vmem:[#allocation7 + $0x24] ss:$8 sps:$4 sm:$0xff]  }
 0x12f   :  { %v348_v61 = vpop.permute.xlu1 %347  ;;  %v344_v62 = vpop.permute.xlu0 %343  ;;  %v2364_v57 = vld [vmem:[#allocation7 + $0xa4] ss:$8 sps:$4 sm:$0xff]  }
 0x130   :  { %v1278_v63 = vadd.f32 %v1246_v59, %v348_v61  ;;  %v1277_v0 = vadd.f32 %v1245_v39, %v344_v62  ;;  %v1343_v1 = vpack.c.bf16 %v1326_v50, %v1325_v60  ;;  %v759_v39 = vrot.slane %v2772_v46, %v2623_v5  ;;  %v2366_v50 = vld [vmem:[#allocation7 + $0x20] ss:$8 sps:$4 sm:$0xff]  }
 0x131   :  { %670 = vbcast.lane.b32.xlu1 %v664_v58, 264  ;;  %666 = vbcast.lane.b32.xlu0 %v664_v58, 256  ;;  %v2367_v60 = vld [vmem:[#allocation7 + $0xa0] ss:$8 sps:$4 sm:$0xff]  }
 0x132   :  { %v1310_v3 = vmax.f32 %v1278_v63, 0.0  ;;  %v1309_v4 = vmax.f32 %v1277_v0, 0.0  ;;  %2225 = vmatprep.subr.bf16.mxu0 %v1343_v1  ;;  %2331 = vmatprep.subr.bf16.mxu1 %v1343_v1  ;;  %v2368_v63 = vld [vmem:[#allocation7 + $0x34] ss:$8 sps:$4 sm:$0xff]  }
 0x133   :  { %v280_v6 = vpop.permute.xlu1 %279  ;;  %v276_v9 = vpop.permute.xlu0 %275  ;;  %v2370_v0 = vld [vmem:[#allocation7 + $0xb4] ss:$8 sps:$4 sm:$0xff]  }
 0x134   :  { %v1335_v10 = vpack.c.bf16 %v1310_v3, %v1309_v4  ;;  %v1264_v51 = vmul.f32 %v1224_v45, %v280_v6  ;;  %v1263_v15 = vmul.f32 %v1224_v45, %v276_v9  ;;  %v2356_v45 = vld [vmem:[#allocation7 + $0x14] ss:$8 sps:$4 sm:$0xff]   ;;  %v778_v4 = vrot.slane %v2772_v46, %v2631_v8  ;;  %v2372_v6 = vld [vmem:[#allocation7 + $0x30] ss:$8 sps:$4 sm:$0xff]  }
 0x135   :  { %678 = vbcast.lane.b32.xlu1 %v664_v58, 280  ;;  %674 = vbcast.lane.b32.xlu0 %v664_v58, 272  ;;  %v2373_v9 = vld [vmem:[#allocation7 + $0xb0] ss:$8 sps:$4 sm:$0xff]  }
 0x136   :  { %2226 = vmatpush3.bf16.msra.mxu0 %v1335_v10  ;;  %2339 = vmatpush3.bf16.msra.mxu1 %v1335_v10 }
 0x137   :  { %v204_v12 = vpop.permute.xlu1 %203  ;;  %v200_v13 = vpop.permute.xlu0 %199 }
 0x138   :  { %v1248_v42 = vmul.f32 %v1208_v55, %v204_v12  ;;  %v1247_v21 = vmul.f32 %v1208_v55, %v200_v13  ;;  %v2361_v55 = vld [vmem:[#allocation7 + $0x90] ss:$8 sps:$4 sm:$0xff]   ;;  %v2374_v12 = vld [vmem:[#allocation7 + $0x44] ss:$8 sps:$4 sm:$0xff]  }
 0x139   :  { %689 = vbcast.lane.b32.xlu1 %v683_v11, 264  ;;  %685 = vbcast.lane.b32.xlu0 %v683_v11, 256  ;;  %v2376_v13 = vld [vmem:[#allocation7 + $0xc4] ss:$8 sps:$4 sm:$0xff]  }
 0x13b   :  { %v432_v16 = vpop.permute.xlu1 %431  ;;  %v428_v43 = vpop.permute.xlu0 %427 }
 0x13c   :  { %v1296_v17 = vadd.f32 %v1264_v51, %v432_v16  ;;  %v1295_v19 = vadd.f32 %v1263_v15, %v428_v43  ;;  %v797_v16 = vrot.slane %v2772_v46, %v2659_v24  ;;  %v2378_v43 = vld [vmem:[#allocation7 + $0x40] ss:$8 sps:$4 sm:$0xff]  }
 0x13d   :  { %697 = vbcast.lane.b32.xlu1 %v683_v11, 280  ;;  %693 = vbcast.lane.b32.xlu0 %v683_v11, 272 }
 0x13e   :  { %v1328_v23 = vmax.f32 %v1296_v17, 0.0  ;;  %v1327_v26 = vmax.f32 %v1295_v19, 0.0  ;;  %v2379_v17 = vld [vmem:[#allocation7 + $0xc0] ss:$8 sps:$4 sm:$0xff]  }
 0x13f   :  { %v356_v27 = vpop.permute.xlu1 %355  ;;  %v352_v28 = vpop.permute.xlu0 %351 }
 0x140   :  { %v1280_v29 = vadd.f32 %v1248_v42, %v356_v27  ;;  %v1279_v31 = vadd.f32 %v1247_v21, %v352_v28  ;;  %v1344_v32 = vpack.c.bf16 %v1328_v23, %v1327_v26  ;;  %v2380_v42 = vld [vmem:[#allocation7 + $0x54] ss:$8 sps:$4 sm:$0xff]   ;;  %v816_v27 = vrot.slane %v2772_v46, %v2628_v7  ;;  %v2384_v28 = vld [vmem:[#allocation7 + $0x50] ss:$8 sps:$4 sm:$0xff]  }
 0x141   :  { %708 = vbcast.lane.b32.xlu1 %v702_v20, 264  ;;  %704 = vbcast.lane.b32.xlu0 %v702_v20, 256  ;;  %v2382_v21 = vld [vmem:[#allocation7 + $0xd4] ss:$8 sps:$4 sm:$0xff]  }
 0x142   :  { %v1312_v33 = vmax.f32 %v1280_v29, 0.0  ;;  %v1311_v35 = vmax.f32 %v1279_v31, 0.0  ;;  %2227 = vmatprep.subr.bf16.mxu0 %v1344_v32  ;;  %2332 = vmatprep.subr.bf16.mxu1 %v1344_v32  ;;  %v2385_v29 = vld [vmem:[#allocation7 + $0xd0] ss:$8 sps:$4 sm:$0xff]  }
 0x143   :  { %v2762_v36 = vpop.permute.xlu1 %442  ;;  %v2764_v38 = vpop.permute.xlu0 %438 }
 0x144   :  { %v1336_v41 = vpack.c.bf16 %v1312_v33, %v1311_v35  ;;  %v2386_v33 = vld [vmem:[#allocation7 + $0x64] ss:$8 sps:$4 sm:$0xff]  }
 0x145   :  { %716 = vbcast.lane.b32.xlu1 %v702_v20, 280  ;;  %712 = vbcast.lane.b32.xlu0 %v702_v20, 272  ;;  %v2388_v35 = vld [vmem:[#allocation7 + $0xe4] ss:$8 sps:$4 sm:$0xff]  }
 0x146   :  { %2228 = vmatpush3.bf16.msra.mxu0 %v1336_v41  ;;  %2340 = vmatpush3.bf16.msra.mxu1 %v1336_v41 }
 0x147   :  { %v2768_v49 = vpop.permute.xlu1 %450  ;;  %v2770_v30 = vpop.permute.xlu0 %446 }
 0x149   :  { %727 = vbcast.lane.b32.xlu1 %v721_v34, 264  ;;  %723 = vbcast.lane.b32.xlu0 %v721_v34, 256 }
 0x14a   :  { %1570 = vmatmul.mubr.bf16.vlgmr.msra.gmra.mrb[0].mxu0 %v2350_v44  ;;  %1634 = vmatmul.mubr.bf16.vlgmr.msra.gmra.mrb[0].mxu1 %v2353_v47  ;;  %v835_v44 = vrot.slane %v2772_v46, %v2640_v14  ;;  %v2390_v47 = vld [vmem:[#allocation7 + $0x60] ss:$8 sps:$4 sm:$0xff]  }
 0x14b   :  { %v2774_v48 = vpop.permute.xlu1 %461  ;;  %v2776_v25 = vpop.permute.xlu0 %457  ;;  %1577 = vmatprep.mubr.bf16.mxu0 %v2356_v45  ;;  %1641 = vmatprep.mubr.bf16.mxu1 %v2358_v53  ;;  %v2391_v45 = vld [vmem:[#allocation7 + $0xe0] ss:$8 sps:$4 sm:$0xff]  }
 0x14d   :  { %735 = vbcast.lane.b32.xlu1 %v721_v34, 280  ;;  %731 = vbcast.lane.b32.xlu0 %v721_v34, 272 }
 0x14f   :  { %v2780_v56 = vpop.permute.xlu1 %469  ;;  %v2782_v37 = vpop.permute.xlu0 %465 }
 0x151   :  { %746 = vbcast.lane.b32.xlu1 %v740_v40, 264  ;;  %742 = vbcast.lane.b32.xlu0 %v740_v40, 256 }
 0x152   :  { %1578 = vmatmul.mubr.bf16.gmra.mrb[4].mxu0 %v2360_v54  ;;  %1642 = vmatmul.mubr.bf16.gmra.mrb[4].mxu1 %v2361_v55  ;;  %v2392_v54 = vld [vmem:[#allocation7 + $0x74] ss:$8 sps:$4 sm:$0xff]  }
 0x153   :  { %v2784_v58 = vpop.permute.xlu1 %480  ;;  %v2786_v59 = vpop.permute.xlu0 %476  ;;  %1585 = vmatprep.mubr.bf16.mxu0 %v2362_v52  ;;  %1649 = vmatprep.mubr.bf16.mxu1 %v2364_v57  ;;  %v2394_v55 = vld [vmem:[#allocation7 + $0xf4] ss:$8 sps:$4 sm:$0xff]  }
 0x154   :  { %3493 = vst [vmem:[#allocation15_spill] sm:$0xff] %v2784_v58  ;;  %3494 = vst [vmem:[#allocation16_spill] sm:$0xff] %v2786_v59 }
 0x155   :  { %754 = vbcast.lane.b32.xlu1 %v740_v40, 280  ;;  %750 = vbcast.lane.b32.xlu0 %v740_v40, 272 }
 0x157   :  { %v2790_v61 = vpop.permute.xlu1 %488  ;;  %v2792_v62 = vpop.permute.xlu0 %484 }
 0x158   :  { %3495 = vst [vmem:[#allocation17_spill] sm:$0xff] %v2790_v61  ;;  %3496 = vst [vmem:[#allocation18_spill] sm:$0xff] %v2792_v62 }
 0x159   :  { %765 = vbcast.lane.b32.xlu1 %v759_v39, 264  ;;  %761 = vbcast.lane.b32.xlu0 %v759_v39, 256 }
 0x15a   :  { %1586 = vmatmul.mubr.bf16.gmra.mrb[8].mxu0 %v2366_v50  ;;  %1650 = vmatmul.mubr.bf16.gmra.mrb[8].mxu1 %v2367_v60  ;;  %v2396_v50 = vld [vmem:[#allocation7 + $0x70] ss:$8 sps:$4 sm:$0xff]  }
 0x15b   :  { %v2794_v1 = vpop.permute.xlu1 %499  ;;  %v2796_v3 = vpop.permute.xlu0 %495  ;;  %1593 = vmatprep.mubr.bf16.mxu0 %v2368_v63  ;;  %1657 = vmatprep.mubr.bf16.mxu1 %v2370_v0  ;;  %v2397_v60 = vld [vmem:[#allocation7 + $0xf0] ss:$8 sps:$4 sm:$0xff]  }
 0x15c   :  { %3497 = vst [vmem:[#allocation19_spill] sm:$0xff] %v2794_v1  ;;  %3498 = vst [vmem:[#allocation20_spill] sm:$0xff] %v2796_v3 }
 0x15d   :  { %773 = vbcast.lane.b32.xlu1 %v759_v39, 280  ;;  %769 = vbcast.lane.b32.xlu0 %v759_v39, 272  ;;  %v854_v39 = vrot.slane %v2772_v46, %v2647_v18 }
 0x15f   :  { %v2800_v10 = vpop.permute.xlu1 %507  ;;  %v2802_v11 = vpop.permute.xlu0 %503 }
 0x160   :  { %3499 = vst [vmem:[#allocation21_spill] sm:$0xff] %v2800_v10  ;;  %3500 = vst [vmem:[#allocation22_spill] sm:$0xff] %v2802_v11 }
 0x161   :  { %784 = vbcast.lane.b32.xlu1 %v778_v4, 264  ;;  %780 = vbcast.lane.b32.xlu0 %v778_v4, 256 }
 0x162   :  { %1594 = vmatmul.mubr.bf16.gmra.mrb[12].mxu0 %v2372_v6  ;;  %1658 = vmatmul.mubr.bf16.gmra.mrb[12].mxu1 %v2373_v9  ;;  %v873_v9 = vrot.slane %v2772_v46, %v2654_v22 }
 0x163   :  { %v2804_v51 = vpop.permute.xlu1 %518  ;;  %v2806_v15 = vpop.permute.xlu0 %514  ;;  %1601 = vmatprep.mubr.bf16.mxu0 %v2374_v12  ;;  %1665 = vmatprep.mubr.bf16.mxu1 %v2376_v13 }
 0x165   :  { %792 = vbcast.lane.b32.xlu1 %v778_v4, 280  ;;  %788 = vbcast.lane.b32.xlu0 %v778_v4, 272 }
 0x167   :  { %v2810_v19 = vpop.permute.xlu1 %526  ;;  %v2812_v20 = vpop.permute.xlu0 %522 }
 0x169   :  { %803 = vbcast.lane.b32.xlu1 %v797_v16, 264  ;;  %799 = vbcast.lane.b32.xlu0 %v797_v16, 256 }
 0x16a   :  { %1602 = vmatmul.mubr.bf16.gmra.mrb[16].mxu0 %v2378_v43  ;;  %1666 = vmatmul.mubr.bf16.gmra.mrb[16].mxu1 %v2379_v17 }
 0x16b   :  { %v2814_v23 = vpop.permute.xlu1 %537  ;;  %v2816_v26 = vpop.permute.xlu0 %533  ;;  %1609 = vmatprep.mubr.bf16.mxu0 %v2380_v42  ;;  %1673 = vmatprep.mubr.bf16.mxu1 %v2382_v21 }
 0x16d   :  { %811 = vbcast.lane.b32.xlu1 %v797_v16, 280  ;;  %807 = vbcast.lane.b32.xlu0 %v797_v16, 272  ;;  %v2854_v16 = vld [vmem:[#allocation8 + $0x28] sm:$0xff] }
 0x16e   :  { %v892_v42 = vrot.slane %v2854_v16, %v2616_v2 }
 0x16f   :  { %v2820_v31 = vpop.permute.xlu1 %545  ;;  %v2822_v32 = vpop.permute.xlu0 %541 }
 0x171   :  { %822 = vbcast.lane.b32.xlu1 %v816_v27, 264  ;;  %818 = vbcast.lane.b32.xlu0 %v816_v27, 256 }
 0x172   :  { %1610 = vmatmul.mubr.bf16.gmra.mrb[20].mxu0 %v2384_v28  ;;  %1674 = vmatmul.mubr.bf16.gmra.mrb[20].mxu1 %v2385_v29 }
 0x173   :  { %v2824_v41 = vpop.permute.xlu1 %556  ;;  %v2826_v34 = vpop.permute.xlu0 %552  ;;  %1617 = vmatprep.mubr.bf16.mxu0 %v2386_v33  ;;  %1681 = vmatprep.mubr.bf16.mxu1 %v2388_v35  ;;  %v2873_v35 = vrot.slane %v2854_v16, %v2623_v5 }
 0x174   :  { %3501 = vst [vmem:[#allocation23_spill] sm:$0xff] %v2824_v41  ;;  %3502 = vst [vmem:[#allocation24_spill] sm:$0xff] %v2826_v34 }
 0x175   :  { %830 = vbcast.lane.b32.xlu1 %v816_v27, 280  ;;  %826 = vbcast.lane.b32.xlu0 %v816_v27, 272  ;;  %v128_v27 = vld [vmem:[#allocation8 + $0x30] sm:$0xff] }
 0x176   :  { %v1044_v33 = vrot.slane %v128_v27, %v2616_v2  ;;  %v1082_v2 = vrot.slane %v128_v27, %v2631_v8 }
 0x177   :  { %v2830_v53 = vpop.permute.xlu1 %564  ;;  %v2832_v40 = vpop.permute.xlu0 %560 }
 0x178   :  { %3503 = vst [vmem:[#allocation25_spill] sm:$0xff] %v2830_v53  ;;  %3504 = vst [vmem:[#allocation26_spill] sm:$0xff] %v2832_v40 }
 0x179   :  { %841 = vbcast.lane.b32.xlu1 %v835_v44, 264  ;;  %837 = vbcast.lane.b32.xlu0 %v835_v44, 256 }
 0x17a   :  { %1618 = vmatmul.mubr.bf16.gmra.mrb[24].mxu0 %v2390_v47  ;;  %1682 = vmatmul.mubr.bf16.gmra.mrb[24].mxu1 %v2391_v45  ;;  %v1063_v45 = vrot.slane %v128_v27, %v2623_v5  ;;  %v1101_v5 = vrot.slane %v128_v27, %v2659_v24 }
 0x17b   :  { %v2834_v52 = vpop.permute.xlu1 %575  ;;  %v2836_v57 = vpop.permute.xlu0 %571  ;;  %1625 = vmatprep.mubr.bf16.mxu0 %v2392_v54  ;;  %1689 = vmatprep.mubr.bf16.mxu1 %v2394_v55 }
 0x17c   :  { %3505 = vst [vmem:[#allocation27_spill] sm:$0xff] %v2834_v52  ;;  %3506 = vst [vmem:[#allocation28_spill] sm:$0xff] %v2836_v57 }
 0x17d   :  { %849 = vbcast.lane.b32.xlu1 %v835_v44, 280  ;;  %845 = vbcast.lane.b32.xlu0 %v835_v44, 272 }
 0x17f   :  { %v2840_v63 = vpop.permute.xlu1 %583  ;;  %v2842_v0 = vpop.permute.xlu0 %579 }
 0x180   :  { %3507 = vst [vmem:[#allocation29_spill] sm:$0xff] %v2840_v63  ;;  %3508 = vst [vmem:[#allocation30_spill] sm:$0xff] %v2842_v0 }
 0x181   :  { %860 = vbcast.lane.b32.xlu1 %v854_v39, 264  ;;  %856 = vbcast.lane.b32.xlu0 %v854_v39, 256 }
 0x182   :  { %1626 = vmatmul.mubr.bf16.gmra.mrb[28].mxu0 %v2396_v50  ;;  %1690 = vmatmul.mubr.bf16.gmra.mrb[28].mxu1 %v2397_v60 }
 0x183   :  { %v2844_v4 = vpop.permute.xlu1 %594  ;;  %v2846_v6 = vpop.permute.xlu0 %590 }
 0x185   :  { %868 = vbcast.lane.b32.xlu1 %v854_v39, 280  ;;  %864 = vbcast.lane.b32.xlu0 %v854_v39, 272 }
 0x187   :  { %v2850_v12 = vpop.permute.xlu1 %602  ;;  %v2852_v13 = vpop.permute.xlu0 %598 }
 0x189   :  { %879 = vbcast.lane.b32.xlu1 %v873_v9, 264  ;;  %875 = vbcast.lane.b32.xlu0 %v873_v9, 256 }
 0x18b   :  { %v2856_v43 = vpop.permute.xlu1 %613  ;;  %v2858_v17 = vpop.permute.xlu0 %609 }
 0x18c   :  { %3509 = vst [vmem:[#allocation31_spill] sm:$0xff] %v2856_v43  ;;  %3510 = vst [vmem:[#allocation32_spill] sm:$0xff] %v2858_v17  ;;  %v1006_v43 = vrot.slane %v2854_v16, %v2647_v18 }
 0x18d   :  { %887 = vbcast.lane.b32.xlu1 %v873_v9, 280  ;;  %883 = vbcast.lane.b32.xlu0 %v873_v9, 272 }
 0x18f   :  { %v2862_v21 = vpop.permute.xlu1 %621  ;;  %v2864_v46 = vpop.permute.xlu0 %617 }
 0x190   :  { %3511 = vst [vmem:[#allocation33_spill] sm:$0xff] %v2862_v21  ;;  %3512 = vst [vmem:[#allocation34_spill] sm:$0xff] %v2864_v46 }
 0x191   :  { %898 = vbcast.lane.b32.xlu1 %v892_v42, 264  ;;  %894 = vbcast.lane.b32.xlu0 %v892_v42, 256 }
 0x193   :  { %v2866_v28 = vpop.permute.xlu1 %632  ;;  %v2868_v29 = vpop.permute.xlu0 %628 }
 0x194   :  { %3513 = vst [vmem:[#allocation35_spill] sm:$0xff] %v2866_v28  ;;  %3514 = vst [vmem:[#allocation36_spill] sm:$0xff] %v2868_v29 }
 0x195   :  { %906 = vbcast.lane.b32.xlu1 %v892_v42, 280  ;;  %902 = vbcast.lane.b32.xlu0 %v892_v42, 272 }
 0x197   :  { %v2875_v44 = vpop.permute.xlu1 %640  ;;  %v2877_v47 = vpop.permute.xlu0 %636 }
 0x198   :  { %3515 = vst [vmem:[#allocation37_spill] sm:$0xff] %v2875_v44  ;;  %3516 = vst [vmem:[#allocation38_spill] sm:$0xff] %v2877_v47 }
 0x199   :  { %1046 = vbcast.lane.b32.xlu1 %v1044_v33, 256  ;;  %913 = vbcast.lane.b32.xlu0 %v2873_v35, 256 }
 0x19b   :  { %v2881_v54 = vpop.permute.xlu1 %651  ;;  %v2883_v55 = vpop.permute.xlu0 %647 }
 0x19c   :  { %3517 = vst [vmem:[#allocation39_spill] sm:$0xff] %v2881_v54  ;;  %3518 = vst [vmem:[#allocation40_spill] sm:$0xff] %v2883_v55 }
 0x19d   :  { %1065 = vbcast.lane.b32.xlu1 %v1063_v45, 256  ;;  %1050 = vbcast.lane.b32.xlu0 %v1044_v33, 264 }
 0x19f   :  { %v2886_v39 = vpop.permute.xlu1 %659  ;;  %v2888_v50 = vpop.permute.xlu0 %655 }
 0x1a0   :  { %3519 = vst [vmem:[#allocation41_spill] sm:$0xff] %v2886_v39  ;;  %3520 = vst [vmem:[#allocation42_spill] sm:$0xff] %v2888_v50  ;;  %v1120_v50 = vrot.slane %v128_v27, %v2628_v7 }
 0x1a1   :  { %1084 = vbcast.lane.b32.xlu1 %v1082_v2, 256  ;;  %1069 = vbcast.lane.b32.xlu0 %v1063_v45, 264 }
 0x1a3   :  { %v2890_v60 = vpop.permute.xlu1 %670  ;;  %v2892_v9 = vpop.permute.xlu0 %666 }
 0x1a5   :  { %1054 = vbcast.lane.b32.xlu1 %v1044_v33, 272  ;;  %1088 = vbcast.lane.b32.xlu0 %v1082_v2, 264 }
 0x1a7   :  { %v2895_v42 = vpop.permute.xlu1 %678  ;;  %v2897_v44 = vpop.permute.xlu0 %674 }
 0x1a8   :  { %3521 = vst [vmem:[#allocation43_spill] sm:$0xff] %v2895_v42  ;;  %3522 = vst [vmem:[#allocation44_spill] sm:$0xff] %v2897_v44  ;;  %v1025_v42 = vrot.slane %v2854_v16, %v2654_v22 }
 0x1a9   :  { %1103 = vbcast.lane.b32.xlu1 %v1101_v5, 256  ;;  %1073 = vbcast.lane.b32.xlu0 %v1063_v45, 272 }
 0x1ab   :  { %v2899_v21 = vpop.permute.xlu1 %689  ;;  %v2901_v39 = vpop.permute.xlu0 %685 }
 0x1ac   :  { %3523 = vst [vmem:[#allocation45_spill] sm:$0xff] %v2899_v21  ;;  %3524 = vst [vmem:[#allocation46_spill] sm:$0xff] %v2901_v39  ;;  %v1139_v21 = vrot.slane %v128_v27, %v2640_v14 }
 0x1ad   :  { %1092 = vbcast.lane.b32.xlu1 %v1082_v2, 272  ;;  %1107 = vbcast.lane.b32.xlu0 %v1101_v5, 264 }
 0x1af   :  { %v2904_v63 = vpop.permute.xlu1 %697  ;;  %v2906_v10 = vpop.permute.xlu0 %693 }
 0x1b0   :  { %3525 = vst [vmem:[#allocation47_spill] sm:$0xff] %v2904_v63  ;;  %3526 = vst [vmem:[#allocation48_spill] sm:$0xff] %v2906_v10  ;;  %v1158_v10 = vrot.slane %v128_v27, %v2647_v18 }
 0x1b1   :  { %1126 = vbcast.lane.b32.xlu1 %v1120_v50, 264  ;;  %1122 = vbcast.lane.b32.xlu0 %v1120_v50, 256 }
 0x1b3   :  { %v2908_v54 = vpop.permute.xlu1 %708  ;;  %v2910_v0 = vpop.permute.xlu0 %704 }
 0x1b4   :  { %3527 = vst [vmem:[#allocation49_spill] sm:$0xff] %v2908_v54  ;;  %3528 = vst [vmem:[#allocation50_spill] sm:$0xff] %v2910_v0 }
 0x1b5   :  { %1077 = vbcast.lane.b32.xlu1 %v1063_v45, 280  ;;  %1058 = vbcast.lane.b32.xlu0 %v1044_v33, 280 }
 0x1b7   :  { %v2913_v47 = vpop.permute.xlu1 %716  ;;  %v2915_v39 = vpop.permute.xlu0 %712 }
 0x1b8   :  { %3529 = vst [vmem:[#allocation51_spill] sm:$0xff] %v2913_v47  ;;  %3530 = vst [vmem:[#allocation52_spill] sm:$0xff] %v2915_v39  ;;  %v1177_v39 = vrot.slane %v128_v27, %v2654_v22 }
 0x1b9   :  { %1141 = vbcast.lane.b32.xlu1 %v1139_v21, 256  ;;  %1111 = vbcast.lane.b32.xlu0 %v1101_v5, 272 }
 0x1bb   :  { %v2917_v11 = vpop.permute.xlu1 %727  ;;  %v2919_v63 = vpop.permute.xlu0 %723 }
 0x1bc   :  { %3531 = vst [vmem:[#allocation53_spill] sm:$0xff] %v2917_v11  ;;  %3532 = vst [vmem:[#allocation54_spill] sm:$0xff] %v2919_v63 }
 0x1bd   :  { %1096 = vbcast.lane.b32.xlu1 %v1082_v2, 280  ;;  %1145 = vbcast.lane.b32.xlu0 %v1139_v21, 264 }
 0x1bf   :  { %v2922_v54 = vpop.permute.xlu1 %735  ;;  %v2924_v45 = vpop.permute.xlu0 %731 }
 0x1c0   :  { %3533 = vst [vmem:[#allocation55_spill] sm:$0xff] %v2922_v54  ;;  %3534 = vst [vmem:[#allocation56_spill] sm:$0xff] %v2924_v45 }
 0x1c1   :  { %1160 = vbcast.lane.b32.xlu1 %v1158_v10, 256  ;;  %1130 = vbcast.lane.b32.xlu0 %v1120_v50, 272 }
 0x1c3   :  { %v2926_v33 = vpop.permute.xlu1 %746  ;;  %v2928_v47 = vpop.permute.xlu0 %742 }
 0x1c5   :  { %1115 = vbcast.lane.b32.xlu1 %v1101_v5, 280  ;;  %1164 = vbcast.lane.b32.xlu0 %v1158_v10, 264 }
 0x1c7   :  { %v2931_v11 = vpop.permute.xlu1 %754  ;;  %v2933_v2 = vpop.permute.xlu0 %750 }
 0x1c9   :  { %1179 = vbcast.lane.b32.xlu1 %v1177_v39, 256  ;;  %1149 = vbcast.lane.b32.xlu0 %v1139_v21, 272 }
 0x1cb   :  { %v2935_v63 = vpop.permute.xlu1 %765  ;;  %v2937_v54 = vpop.permute.xlu0 %761 }
 0x1cd   :  { %1134 = vbcast.lane.b32.xlu1 %v1120_v50, 280  ;;  %1183 = vbcast.lane.b32.xlu0 %v1177_v39, 264  ;;  %v930_v50 = vrot.slane %v2854_v16, %v2631_v8  ;;  %v968_v8 = vrot.slane %v2854_v16, %v2628_v7 }
 0x1cf   :  { %v2939_v45 = vpop.permute.xlu1 %773  ;;  %v2941_v0 = vpop.permute.xlu0 %769 }
 0x1d0   :  { %3535 = vst [vmem:[#allocation57_spill] sm:$0xff] %v2939_v45 }
 0x1d1   :  { %1153 = vbcast.lane.b32.xlu1 %v1139_v21, 280  ;;  %1168 = vbcast.lane.b32.xlu0 %v1158_v10, 272 }
 0x1d3   :  { %v2943_v5 = vpop.permute.xlu1 %784  ;;  %v2945_v27 = vpop.permute.xlu0 %780 }
 0x1d4   :  { %3536 = vst [vmem:[#allocation58_spill] sm:$0xff] %v2943_v5  ;;  %3537 = vst [vmem:[#allocation59_spill] sm:$0xff] %v2945_v27 }
 0x1d5   :  { %1172 = vbcast.lane.b32.xlu1 %v1158_v10, 280  ;;  %1187 = vbcast.lane.b32.xlu0 %v1177_v39, 272  ;;  %v949_v10 = vrot.slane %v2854_v16, %v2659_v24 }
 0x1d7   :  { %v2947_v55 = vpop.permute.xlu1 %792  ;;  %v2949_v46 = vpop.permute.xlu0 %788 }
 0x1d8   :  { %3538 = vst [vmem:[#allocation60_spill] sm:$0xff] %v2947_v55  ;;  %3539 = vst [vmem:[#allocation61_spill] sm:$0xff] %v2949_v46 }
 0x1d9   :  { %917 = vbcast.lane.b32.xlu1 %v2873_v35, 264  ;;  %1191 = vbcast.lane.b32.xlu0 %v1177_v39, 280 }
 0x1db   :  { %v2954_v52 = vpop.permute.xlu1 %803  ;;  %v2956_v21 = vpop.permute.xlu0 %799 }
 0x1dc   :  { %3540 = vst [vmem:[#allocation62_spill] sm:$0xff] %v2954_v52  ;;  %3541 = vst [vmem:[#allocation63_spill] sm:$0xff] %v2956_v21 }
 0x1dd   :  { %936 = vbcast.lane.b32.xlu1 %v930_v50, 264  ;;  %932 = vbcast.lane.b32.xlu0 %v930_v50, 256 }
 0x1df   :  { %v2960_v1 = vpop.permute.xlu1 %811  ;;  %v2962_v29 = vpop.permute.xlu0 %807 }
 0x1e0   :  { %3542 = vst [vmem:[#allocation64_spill] sm:$0xff] %v2960_v1  ;;  %3543 = vst [vmem:[#allocation65_spill] sm:$0xff] %v2962_v29  ;;  %v987_v29 = vrot.slane %v2854_v16, %v2640_v14 }
 0x1e1   :  { %951 = vbcast.lane.b32.xlu1 %v949_v10, 256  ;;  %921 = vbcast.lane.b32.xlu0 %v2873_v35, 272 }
 0x1e3   :  { %v2965_v39 = vpop.permute.xlu1 %822  ;;  %v2967_v28 = vpop.permute.xlu0 %818 }
 0x1e5   :  { %940 = vbcast.lane.b32.xlu1 %v930_v50, 272  ;;  %955 = vbcast.lane.b32.xlu0 %v949_v10, 264 }
 0x1e7   :  { %v2971_v52 = vpop.permute.xlu1 %830  ;;  %v2973_v21 = vpop.permute.xlu0 %826 }
 0x1e9   :  { %974 = vbcast.lane.b32.xlu1 %v968_v8, 264  ;;  %970 = vbcast.lane.b32.xlu0 %v968_v8, 256 }
 0x1eb   :  { %v2975_v24 = vpop.permute.xlu1 %841  ;;  %v2977_v1 = vpop.permute.xlu0 %837 }
 0x1ed   :  { %959 = vbcast.lane.b32.xlu1 %v949_v10, 272  ;;  %925 = vbcast.lane.b32.xlu0 %v2873_v35, 280 }
 0x1ef   :  { %v2982_v57 = vpop.permute.xlu1 %849  ;;  %v2984_v3 = vpop.permute.xlu0 %845 }
 0x1f0   :  { %3544 = vst [vmem:[#allocation66_spill] sm:$0xff] %v2982_v57 }
 0x1f1   :  { %993 = vbcast.lane.b32.xlu1 %v987_v29, 264  ;;  %989 = vbcast.lane.b32.xlu0 %v987_v29, 256 }
 0x1f3   :  { %v2986_v7 = vpop.permute.xlu1 %860  ;;  %v2988_v53 = vpop.permute.xlu0 %856 }
 0x1f4   :  { %3545 = vst [vmem:[#allocation67_spill] sm:$0xff] %v2986_v7  ;;  %3546 = vst [vmem:[#allocation68_spill] sm:$0xff] %v2988_v53 }
 0x1f5   :  { %978 = vbcast.lane.b32.xlu1 %v968_v8, 272  ;;  %944 = vbcast.lane.b32.xlu0 %v930_v50, 280 }
 0x1f7   :  { %v2992_v55 = vpop.permute.xlu1 %868  ;;  %v2994_v35 = vpop.permute.xlu0 %864 }
 0x1f8   :  { %3547 = vst [vmem:[#allocation69_spill] sm:$0xff] %v2992_v55  ;;  %3548 = vst [vmem:[#allocation70_spill] sm:$0xff] %v2994_v35 }
 0x1f9   :  { %1012 = vbcast.lane.b32.xlu1 %v1006_v43, 264  ;;  %1008 = vbcast.lane.b32.xlu0 %v1006_v43, 256 }
 0x1fb   :  { %v2996_v14 = vpop.permute.xlu1 %879  ;;  %v2998_v17 = vpop.permute.xlu0 %875 }
 0x1fc   :  { %3549 = vst [vmem:[#allocation71_spill] sm:$0xff] %v2996_v14  ;;  %3550 = vst [vmem:[#allocation72_spill] sm:$0xff] %v2998_v17 }
 0x1fd   :  { %997 = vbcast.lane.b32.xlu1 %v987_v29, 272  ;;  %963 = vbcast.lane.b32.xlu0 %v949_v10, 280 }
 0x1ff   :  { %v3002_v46 = vpop.permute.xlu1 %887  ;;  %v3004_v50 = vpop.permute.xlu0 %883 }
 0x200   :  { %3551 = vst [vmem:[#allocation73_spill] sm:$0xff] %v3002_v46  ;;  %3552 = vst [vmem:[#allocation74_spill] sm:$0xff] %v3004_v50 }
 0x201   :  { %1031 = vbcast.lane.b32.xlu1 %v1025_v42, 264  ;;  %1027 = vbcast.lane.b32.xlu0 %v1025_v42, 256 }
 0x203   :  { %v3006_v18 = vpop.permute.xlu1 %898  ;;  %v895_v55 = vpop.permute.xlu0 %894 }
 0x205   :  { %1016 = vbcast.lane.b32.xlu1 %v1006_v43, 272  ;;  %982 = vbcast.lane.b32.xlu0 %v968_v8, 280 }
 0x207   :  { %v3008_v35 = vpop.permute.xlu1 %906  ;;  %v3010_v14 = vpop.permute.xlu0 %902 }
 0x209   :  { %1035 = vbcast.lane.b32.xlu1 %v1025_v42, 272  ;;  %1001 = vbcast.lane.b32.xlu0 %v987_v29, 280 }
 0x20b   :  { %v1047_v10 = vpop.permute.xlu1 %1046  ;;  %v3012_v17 = vpop.permute.xlu0 %913 }
 0x20c   :  { %3553 = vst [vmem:[#allocation75_spill] sm:$0xff] %v3012_v17 }
 0x20d   :  { %1039 = vbcast.lane.b32.xlu1 %v1025_v42, 280  ;;  %1020 = vbcast.lane.b32.xlu0 %v1006_v43, 280 }
 0x20f   :  { %v3014_v22 = vpop.permute.xlu1 %1065  ;;  %v1051_v16 = vpop.permute.xlu0 %1050 }
 0x213   :  { %v3016_v46 = vpop.permute.xlu1 %1084  ;;  %v3018_v50 = vpop.permute.xlu0 %1069 }
 0x214   :  { %3554 = vst [vmem:[#allocation76_spill] sm:$0xff] %v3016_v46 }
 0x217   :  { %v3020_v61 = vpop.permute.xlu1 %1054  ;;  %v3022_v8 = vpop.permute.xlu0 %1088 }
 0x218   :  { %3555 = vst [vmem:[#allocation77_spill] sm:$0xff] %v3022_v8 }
 0x21b   :  { %v3024_v40 = vpop.permute.xlu1 %1103  ;;  %v3026_v62 = vpop.permute.xlu0 %1073 }
 0x21c   :  { %3556 = vst [vmem:[#allocation78_spill] sm:$0xff] %v3024_v40  ;;  %3557 = vst [vmem:[#allocation79_spill] sm:$0xff] %v3026_v62 }
 0x21d   :  { %v2229_v29 = vpop.f32.mrb[0].mxu0  ;;  %v2277_v7 = vpop.f32.mrb[0].mxu1 }
 0x21e   :  { %v2230_v17 = vpop.f32.mrb[1].mxu0  ;;  %v2278_v42 = vpop.f32.mrb[1].mxu1 }
 0x21f   :  { %v2231_v43 = vadd.f32 %v2230_v17, %v2229_v29  ;;  %v2279_v5 = vadd.f32 %v2278_v42, %v2277_v7  ;;  %v2232_v41 = vpop.f32.mrb[2].mxu0  ;;  %v2280_v58 = vpop.f32.mrb[2].mxu1 }
 0x220   :  { %v3028_v53 = vpop.permute.xlu1 %1092  ;;  %v3030_v46 = vpop.permute.xlu0 %1107 }
 0x221   :  { %3558 = vst [vmem:[#allocation80_spill] sm:$0xff] %v3028_v53  ;;  %3559 = vst [vmem:[#allocation81_spill] sm:$0xff] %v3030_v46  ;;  %v1698_v57 = vadd.f32 %v2231_v43, %v2764_v38  ;;  %v3034_v8 = vadd.f32 %v2279_v5, %v2806_v15  ;;  %v2233_v40 = vpop.f32.mrb[3].mxu0  ;;  %v2281_v27 = vpop.f32.mrb[3].mxu1 }
 0x222   :  { %v2234_v44 = vadd.f32 %v2233_v40, %v2232_v41  ;;  %v2282_v34 = vadd.f32 %v2281_v27, %v2280_v58 }
 0x223   :  { %v1730_v59 = vmax.f32 %v1698_v57, 0.0  ;;  %v3470_v45 = vmax.f32 %v3034_v8, 0.0 }
 0x224   :  { %v1699_v17 = vadd.f32 %v2234_v44, %v2762_v36  ;;  %v3039_v7 = vadd.f32 %v2282_v34, %v2804_v51  ;;  %v1127_v29 = vpop.permute.xlu1 %1126  ;;  %v1123_v42 = vpop.permute.xlu0 %1122 }
 0x225   :  { %v1762_v46 = vmul.f32 %v1730_v59, %v2846_v6  ;;  %v1898_v38 = vmul.f32 %v1730_v59, %v2928_v47  ;;  %v1914_v15 = vmul.f32 %v3470_v45, %v2967_v28  ;;  %v2235_v41 = vpop.f32.mrb[4].mxu0  ;;  %v2283_v58 = vpop.f32.mrb[4].mxu1 }
 0x226   :  { %v1731_v40 = vmax.f32 %v1699_v17, 0.0  ;;  %v1747_v57 = vmax.f32 %v3039_v7, 0.0  ;;  %v2236_v5 = vpop.f32.mrb[5].mxu0  ;;  %v2284_v36 = vpop.f32.mrb[5].mxu1 }
 0x227   :  { %v1794_v44 = vadd.f32 %v1762_v46, %v895_v55  ;;  %v1930_v51 = vadd.f32 %v1898_v38, %v1047_v10  ;;  %v1946_v34 = vadd.f32 %v1914_v15, %v1123_v42  ;;  %v2237_v27 = vadd.f32 %v2236_v5, %v2235_v41  ;;  %v2238_v43 = vpop.f32.mrb[6].mxu0  ;;  %v2286_v53 = vpop.f32.mrb[6].mxu1 }
 0x228   :  { %v1763_v6 = vmul.f32 %v1731_v40, %v2844_v4  ;;  %v1899_v59 = vmul.f32 %v1731_v40, %v2926_v33  ;;  %v1915_v28 = vmul.f32 %v1747_v57, %v2965_v39  ;;  %v2285_v47 = vadd.f32 %v2284_v36, %v2283_v58  ;;  %v3052_v17 = vpop.permute.xlu1 %1077  ;;  %v1059_v45 = vpop.permute.xlu0 %1058 }
 0x229   :  { %v1700_v62 = vadd.f32 %v2237_v27, %v2770_v30  ;;  %v2239_v46 = vpop.f32.mrb[7].mxu0  ;;  %v2287_v55 = vpop.f32.mrb[7].mxu1 }
 0x22a   :  { %v1795_v10 = vadd.f32 %v1763_v6, %v3006_v18  ;;  %v1931_v42 = vadd.f32 %v1899_v59, %v1051_v16  ;;  %v1947_v38 = vadd.f32 %v1915_v28, %v1127_v29  ;;  %v3057_v4 = vadd.f32 %v2285_v47, %v2812_v20 }
 0x22b   :  { %v1732_v15 = vmax.f32 %v1700_v62, 0.0  ;;  %v2240_v33 = vadd.f32 %v2239_v46, %v2238_v43  ;;  %v2288_v41 = vadd.f32 %v2287_v55, %v2286_v53 }
 0x22c   :  { %v1826_v40 = vadd.f32 %v1795_v10, %v1794_v44  ;;  %v1962_v39 = vadd.f32 %v1931_v42, %v1930_v51  ;;  %v1998_v58 = vadd.f32 %v1947_v38, %v1946_v34  ;;  %v3059_v5 = vpop.permute.xlu1 %1141  ;;  %v3061_v36 = vpop.permute.xlu0 %1111  ;;  %v1748_v44 = vmax.f32 %v3057_v4, 0.0 }
 0x22d   :  { %v1764_v30 = vmul.f32 %v1732_v15, %v2852_v13  ;;  %v1900_v27 = vmul.f32 %v1732_v15, %v2933_v2  ;;  %v1701_v18 = vadd.f32 %v2240_v33, %v2768_v49  ;;  %v2241_v16 = vpop.f32.mrb[8].mxu0  ;;  %v2289_v62 = vpop.f32.mrb[8].mxu1 }
 0x22e   :  { %v2242_v29 = vpop.f32.mrb[9].mxu0  ;;  %v2290_v20 = vpop.f32.mrb[9].mxu1 }
 0x22f   :  { %v1796_v43 = vadd.f32 %v1764_v30, %v3010_v14  ;;  %v1932_v53 = vadd.f32 %v1900_v27, %v3020_v61  ;;  %v1733_v51 = vmax.f32 %v1701_v18, 0.0  ;;  %v2244_v34 = vpop.f32.mrb[10].mxu0  ;;  %v2292_v6 = vpop.f32.mrb[10].mxu1  ;;  %v2243_v59 = vadd.f32 %v2242_v29, %v2241_v16 }
 0x230   :  { %v2291_v28 = vadd.f32 %v2290_v20, %v2289_v62  ;;  %v3069_v13 = vpop.permute.xlu1 %1096  ;;  %v1146_v2 = vpop.permute.xlu0 %1145 }
 0x231   :  { %v1827_v47 = vadd.f32 %v1826_v40, %v1796_v43  ;;  %v1963_v49 = vadd.f32 %v1962_v39, %v1932_v53  ;;  %v1765_v46 = vmul.f32 %v1733_v51, %v2850_v12  ;;  %v1901_v55 = vmul.f32 %v1733_v51, %v2931_v11  ;;  %v2245_v10 = vpop.f32.mrb[11].mxu0  ;;  %v2293_v14 = vpop.f32.mrb[11].mxu1 }
 0x232   :  { %v3074_v61 = vadd.f32 %v2243_v59, %v2776_v25  ;;  %v3077_v42 = vadd.f32 %v2291_v28, %v2816_v26  ;;  %v2246_v38 = vadd.f32 %v2245_v10, %v2244_v34  ;;  %v2294_v15 = vadd.f32 %v2293_v14, %v2292_v6 }
 0x233   :  { %v1797_v33 = vadd.f32 %v1765_v46, %v3008_v35  ;;  %v1933_v30 = vadd.f32 %v1901_v55, %v1059_v45  ;;  %v1916_v40 = vmul.f32 %v1748_v44, %v2973_v21  ;;  %v3101_v53 = vadd.f32 %v2288_v41, %v2810_v19 }
 0x234   :  { %v1734_v12 = vmax.f32 %v3074_v61, 0.0  ;;  %v3474_v11 = vmax.f32 %v3077_v42, 0.0  ;;  %v3086_v39 = vadd.f32 %v2246_v38, %v2774_v48  ;;  %v3089_v25 = vadd.f32 %v2294_v15, %v2814_v23  ;;  %v3091_v26 = vpop.permute.xlu1 %1160  ;;  %v1131_v27 = vpop.permute.xlu0 %1130 }
 0x235   :  { %v1828_v18 = vadd.f32 %v1827_v47, %v1797_v33  ;;  %v1964_v35 = vadd.f32 %v1963_v49, %v1933_v30  ;;  %v1948_v45 = vadd.f32 %v1916_v40, %v1131_v27  ;;  %v2247_v16 = vpop.f32.mrb[12].mxu0  ;;  %v2295_v62 = vpop.f32.mrb[12].mxu1  ;;  %v1749_v30 = vmax.f32 %v3101_v53, 0.0 }
 0x236   :  { %v1902_v21 = vmul.f32 %v1734_v12, %v2937_v54  ;;  %v1918_v48 = vmul.f32 %v3474_v11, %v2977_v1  ;;  %v3483_v29 = vmax.f32 %v3086_v39, 0.0  ;;  %v2248_v23 = vpop.f32.mrb[13].mxu0  ;;  %v2296_v20 = vpop.f32.mrb[13].mxu1  ;;  %v3475_v51 = vmax.f32 %v3089_v25, 0.0  ;;  %v3576_v11 = vld [vmem:[#allocation18_spill] sm:$0xff] }
 0x237   :  { %v1965_v43 = vrot.slane %v1964_v35, 4  ;;  %v3104_v34 = vadd.f32 %v1998_v58, %v1948_v45  ;;  %v2250_v6 = vpop.f32.mrb[14].mxu0  ;;  %v2298_v59 = vpop.f32.mrb[14].mxu1  ;;  %v2249_v28 = vadd.f32 %v2248_v23, %v2247_v16  ;;  %v2297_v47 = vadd.f32 %v2296_v20, %v2295_v62 }
 0x238   :  { %v1934_v54 = vadd.f32 %v1902_v21, %v3014_v22  ;;  %v1903_v1 = vmul.f32 %v3483_v29, %v2935_v63  ;;  %v3110_v49 = vpop.permute.xlu1 %1115  ;;  %v3112_v46 = vpop.permute.xlu0 %1164  ;;  %v1829_v19 = vrot.slane %v1828_v18, 4  ;;  %v1919_v58 = vmul.f32 %v3475_v51, %v2975_v24 }
 0x239   :  { %v1966_v41 = vadd.f32 %v1965_v43, %v1964_v35  ;;  %v2251_v55 = vpop.f32.mrb[15].mxu0  ;;  %v2299_v10 = vpop.f32.mrb[15].mxu1  ;;  %v1950_v22 = vadd.f32 %v1918_v48, %v3059_v5  ;;  %v3120_v63 = vadd.f32 %v2249_v28, %v2782_v37  ;;  %v3123_v38 = vadd.f32 %v2297_v47, %v2822_v32 }
 0x23a   :  { %v1935_v14 = vadd.f32 %v1903_v1, %v3018_v50  ;;  %v2252_v15 = vadd.f32 %v2251_v55, %v2250_v6  ;;  %v2300_v40 = vadd.f32 %v2299_v10, %v2298_v59  ;;  %v1951_v27 = vadd.f32 %v1919_v58, %v1146_v2 }
 0x23b   :  { %v1967_v33 = vrot.slane %v1966_v41, 2  ;;  %v3477_v24 = vmax.f32 %v3120_v63, 0.0  ;;  %v3472_v45 = vmax.f32 %v3123_v38, 0.0  ;;  %v1830_v16 = vadd.f32 %v1829_v19, %v1828_v18 }
 0x23c   :  { %v1971_v35 = vadd.f32 %v1935_v14, %v1934_v54  ;;  %v3129_v5 = vadd.f32 %v2252_v15, %v2780_v56  ;;  %v3131_v50 = vpop.permute.xlu1 %1179  ;;  %v1150_v37 = vpop.permute.xlu0 %1149  ;;  %v3134_v62 = vadd.f32 %v2300_v40, %v2820_v31  ;;  %v2007_v21 = vadd.f32 %v1951_v27, %v1950_v22 }
 0x23d   :  { %v1968_v32 = vadd.f32 %v1967_v33, %v1966_v41  ;;  %v2253_v48 = vpop.f32.mrb[16].mxu0  ;;  %v2301_v23 = vpop.f32.mrb[16].mxu1  ;;  %v1904_v2 = vmul.f32 %v3477_v24, %v2941_v0  ;;  %v1920_v56 = vmul.f32 %v3472_v45, %v2984_v3  ;;  %v3561_v18 = vmax.f32 %v3034_v8, 0.0  ;;  %v3562_v3 = vld [vmem:[#allocation79_spill] sm:$0xff]  ;;  %v3563_v41 = vld [vmem:[#allocation57_spill] sm:$0xff] }
 0x23e   :  { %3560 = vst [vmem:[#allocation82_spill] sm:$0xff] %v3134_v62  ;;  %v3476_v20 = vmax.f32 %v3129_v5, 0.0  ;;  %v2254_v43 = vpop.f32.mrb[17].mxu0  ;;  %v2302_v6 = vpop.f32.mrb[17].mxu1  ;;  %v1917_v0 = vmul.f32 %v1749_v30, %v2971_v52  ;;  %v3154_v47 = vmul.f32 %v1747_v57, %v2890_v60  ;;  %v1831_v22 = vrot.slane %v1830_v16, 2  ;;  %v3564_v52 = vld [vmem:[#allocation16_spill] sm:$0xff] }
 0x23f   :  { %v3146_v31 = vmul.f32 %v3561_v18, %v2892_v9  ;;  %v1969_v59 = vrot.slane %v1968_v32, 1  ;;  %v2255_v54 = vadd.f32 %v2254_v43, %v2253_v48  ;;  %v2256_v1 = vpop.f32.mrb[18].mxu0  ;;  %v2304_v28 = vpop.f32.mrb[18].mxu1  ;;  %v1936_v19 = vadd.f32 %v1904_v2, %v3562_v3  ;;  %v3565_v48 = vld [vmem:[#allocation24_spill] sm:$0xff] }
 0x240   :  { %v1905_v9 = vmul.f32 %v3476_v20, %v3563_v41  ;;  %v1952_v8 = vadd.f32 %v1920_v56, %v1150_v37  ;;  %v2303_v58 = vadd.f32 %v2302_v6, %v2301_v23  ;;  %v1135_v55 = vpop.permute.xlu1 %1134  ;;  %v3160_v10 = vpop.permute.xlu0 %1183  ;;  %v3471_v14 = vmax.f32 %v3134_v62, 0.0  ;;  %v3567_v43 = vld [vmem:[#allocation44_spill] sm:$0xff]  ;;  %v3580_v20 = vld [vmem:[#allocation17_spill] sm:$0xff] }
 0x241   :  { %v3164_v15 = vadd.f32 %v2255_v54, %v3564_v52  ;;  %v1949_v7 = vadd.f32 %v1917_v0, %v1135_v55  ;;  %v2257_v60 = vpop.f32.mrb[19].mxu0  ;;  %v2305_v57 = vpop.f32.mrb[19].mxu1  ;;  %v1972_v33 = vadd.f32 %v1971_v35, %v1936_v19  ;;  %v3170_v37 = vadd.f32 %v1969_v59, %v1968_v32  ;;  %v3568_v32 = vld [vmem:[#allocation59_spill] sm:$0xff]  ;;  %v3569_v19 = vld [vmem:[#allocation66_spill] sm:$0xff]  ;;  %v3588_v62 = vld [vmem:[#allocation80_spill] sm:$0xff] }
 0x242   :  { %v1937_v40 = vadd.f32 %v1905_v9, %v3052_v17  ;;  %v2008_v27 = vadd.f32 %v2007_v21, %v1952_v8  ;;  %v3168_v2 = vadd.f32 %v2303_v58, %v3565_v48  ;;  %v3177_v6 = vmul.f32 %v1748_v44, %v3567_v43  ;;  %v3570_v8 = vld [vmem:[#allocation68_spill] sm:$0xff] }
 0x243   :  { %3566 = vst [vmem:[#allocation79_spill] sm:$0xff] %v3170_v37  ;;  %v3478_v23 = vmax.f32 %v3164_v15, 0.0  ;;  %v2000_v56 = vadd.f32 %v3104_v34, %v1949_v7  ;;  %v2258_v54 = vadd.f32 %v2257_v60, %v2256_v1  ;;  %v2306_v17 = vadd.f32 %v2305_v57, %v2304_v28  ;;  %v3571_v28 = vld [vmem:[#allocation15_spill] sm:$0xff]  ;;  %v3573_v60 = vld [vmem:[#allocation76_spill] sm:$0xff] }
 0x244   :  { %v1973_v18 = vadd.f32 %v1972_v33, %v1937_v40  ;;  %v3473_v35 = vmax.f32 %v3168_v2, 0.0  ;;  %v1154_v21 = vpop.permute.xlu1 %1153  ;;  %v3180_v0 = vpop.permute.xlu0 %1168  ;;  %v3182_v3 = vadd.f32 %v1831_v22, %v1830_v16  ;;  %v1921_v4 = vmul.f32 %v3471_v14, %v3569_v19  ;;  %v3572_v16 = vld [vmem:[#allocation23_spill] sm:$0xff] }
 0x245   :  { %v1906_v59 = vmul.f32 %v3478_v23, %v3568_v32  ;;  %v2001_v34 = vrot.slane %v2000_v56, 4  ;;  %v2259_v44 = vpop.f32.mrb[20].mxu0  ;;  %v2307_v41 = vpop.f32.mrb[20].mxu1  ;;  %v3194_v58 = vadd.f32 %v2258_v54, %v3571_v28  ;;  %v3197_v55 = vadd.f32 %v2306_v17, %v3572_v16 }
 0x246   :  { %v1974_v9 = vrot.slane %v1973_v18, 4  ;;  %v1922_v1 = vmul.f32 %v3473_v35, %v3570_v8  ;;  %v2260_v22 = vpop.f32.mrb[21].mxu0  ;;  %v2308_v52 = vpop.f32.mrb[21].mxu1  ;;  %v2067_v7 = vsub.f32 0.0, %v3170_v37  ;;  %v1953_v40 = vadd.f32 %v1921_v4, %v1154_v21 }
 0x247   :  { %v1938_v57 = vadd.f32 %v1906_v59, %v3573_v60  ;;  %v2002_v33 = vadd.f32 %v2001_v34, %v2000_v56  ;;  %v2262_v48 = vpop.f32.mrb[22].mxu0  ;;  %v2310_v43 = vpop.f32.mrb[22].mxu1  ;;  %v3480_v8 = vmax.f32 %v3194_v58, 0.0  ;;  %v3479_v54 = vmax.f32 %v3197_v55, 0.0  ;;  %v3574_v34 = vld [vmem:[#allocation58_spill] sm:$0xff] }
 0x248   :  { %v1975_v32 = vadd.f32 %v1974_v9, %v1973_v18  ;;  %v1954_v19 = vadd.f32 %v1922_v1, %v3091_v26  ;;  %v3204_v28 = vpop.permute.xlu1 %1172  ;;  %v3206_v17 = vpop.permute.xlu0 %1187  ;;  %v2009_v14 = vadd.f32 %v2008_v27, %v1953_v40  ;;  %v2261_v45 = vadd.f32 %v2260_v22, %v2259_v44  ;;  %v3575_v26 = vld [vmem:[#allocation67_spill] sm:$0xff]  ;;  %v3577_v27 = vld [vmem:[#allocation26_spill] sm:$0xff]  ;;  %v3579_v22 = vld [vmem:[#allocation77_spill] sm:$0xff] }
 0x249   :  { %v2003_v16 = vrot.slane %v2002_v33, 2  ;;  %v2309_v35 = vadd.f32 %v2308_v52, %v2307_v41  ;;  %v2263_v59 = vpop.f32.mrb[23].mxu0  ;;  %v2311_v56 = vpop.f32.mrb[23].mxu1  ;;  %v1907_v18 = vmul.f32 %v3480_v8, %v3574_v34  ;;  %v1923_v4 = vmul.f32 %v3479_v54, %v3575_v26  ;;  %v3583_v54 = vld [vmem:[#allocation43_spill] sm:$0xff]  ;;  %v3587_v8 = vld [vmem:[#allocation60_spill] sm:$0xff] }
 0x24a   :  { %v1976_v21 = vrot.slane %v1975_v32, 2  ;;  %v2264_v9 = vadd.f32 %v2263_v59, %v2262_v48  ;;  %v2010_v60 = vrot.slane %v2009_v14, 4  ;;  %v3215_v51 = vadd.f32 %v2261_v45, %v3576_v11 }
 0x24b   :  { %v2004_v1 = vadd.f32 %v2003_v16, %v2002_v33  ;;  %v3218_v44 = vadd.f32 %v2309_v35, %v3577_v27  ;;  %v1939_v52 = vadd.f32 %v1907_v18, %v3579_v22  ;;  %v1955_v40 = vadd.f32 %v1923_v4, %v3112_v46  ;;  %v3581_v4 = vld [vmem:[#allocation61_spill] sm:$0xff]  ;;  %v3582_v27 = vld [vmem:[#allocation70_spill] sm:$0xff] }
 0x24c   :  { %v1977_v41 = vadd.f32 %v1976_v21, %v1975_v32  ;;  %v3223_v34 = vadd.f32 %v2264_v9, %v3580_v20  ;;  %v918_v24 = vpop.permute.xlu1 %917  ;;  %v3225_v23 = vpop.permute.xlu0 %1191  ;;  %v2011_v33 = vadd.f32 %v2010_v60, %v2009_v14  ;;  %v3481_v16 = vmax.f32 %v3215_v51, 0.0 }
 0x24d   :  { %3578 = vst [vmem:[#allocation57_spill] sm:$0xff] %v3218_v44  ;;  %v2005_v48 = vrot.slane %v2004_v1, 1  ;;  %v3482_v11 = vmax.f32 %v3218_v44, 0.0  ;;  %v2265_v45 = vpop.f32.mrb[24].mxu0  ;;  %v2313_v35 = vpop.f32.mrb[24].mxu1  ;;  %v1980_v32 = vadd.f32 %v1939_v52, %v1938_v57  ;;  %v2016_v21 = vadd.f32 %v1955_v40, %v1954_v19  ;;  %v3585_v19 = vld [vmem:[#allocation32_spill] sm:$0xff] }
 0x24e   :  { %v1978_v59 = vrot.slane %v1977_v41, 1  ;;  %v3486_v18 = vmax.f32 %v3223_v34, 0.0  ;;  %v2266_v46 = vpop.f32.mrb[25].mxu0  ;;  %v2314_v26 = vpop.f32.mrb[25].mxu1  ;;  %v2012_v20 = vrot.slane %v2011_v33, 2  ;;  %v1908_v9 = vmul.f32 %v3481_v16, %v3581_v4 }
 0x24f   :  { %v1924_v14 = vmul.f32 %v3482_v11, %v3582_v27  ;;  %v2268_v60 = vpop.f32.mrb[26].mxu0  ;;  %v3236_v22 = vpop.f32.mrb[26].mxu1  ;;  %v3241_v57 = vmul.f32 %v1749_v30, %v3583_v54  ;;  %v1766_v52 = vmul.f32 %v1734_v12, %v3585_v19  ;;  %v2312_v16 = vadd.f32 %v2311_v56, %v2310_v43  ;;  %v3589_v30 = vld [vmem:[#allocation31_spill] sm:$0xff] }
 0x250   :  { %v3246_v40 = vadd.f32 %v1978_v59, %v1977_v41  ;;  %v1909_v4 = vmul.f32 %v3486_v18, %v3587_v8  ;;  %v937_v27 = vpop.permute.xlu1 %936  ;;  %v933_v11 = vpop.permute.xlu0 %932  ;;  %v1833_v29 = vrot.slane %v3182_v3, 1  ;;  %v2013_v37 = vadd.f32 %v2012_v20, %v2011_v33  ;;  %v3592_v33 = vld [vmem:[#allocation25_spill] sm:$0xff] }
 0x251   :  { %3584 = vst [vmem:[#allocation16_spill] sm:$0xff] %v3241_v57  ;;  %v1940_v53 = vadd.f32 %v1908_v9, %v3588_v62  ;;  %v3590_v54 = vmax.f32 %v3086_v39, 0.0  ;;  %v2269_v61 = vpop.f32.mrb[27].mxu0  ;;  %v2317_v12 = vpop.f32.mrb[27].mxu1  ;;  %v2075_v41 = vmul.f32 1.442695, %v2067_v7  ;;  %v3256_v59 = vadd.f32 %v2005_v48, %v2004_v1 }
 0x252   :  { %3586 = vst [vmem:[#allocation24_spill] sm:$0xff] %v3246_v40  ;;  %v1956_v19 = vadd.f32 %v1924_v14, %v3180_v0  ;;  %v1941_v43 = vadd.f32 %v1909_v4, %v3069_v13  ;;  %v2068_v8 = vsub.f32 0.0, %v3246_v40  ;;  %v2014_v56 = vrot.slane %v2013_v37, 1  ;;  %v3594_v9 = vld [vmem:[#allocation75_spill] sm:$0xff] }
 0x253   :  { %v1767_v57 = vmul.f32 %v3590_v54, %v3589_v30  ;;  %3591 = vst [vmem:[#allocation44_spill] sm:$0xff] %v3256_v59  ;;  %v1981_v18 = vadd.f32 %v1980_v32, %v1940_v53  ;;  %v3262_v20 = vadd.f32 %v2312_v16, %v3592_v33  ;;  %v1798_v39 = vadd.f32 %v1766_v52, %v3594_v9 }
 0x254   :  { %v2017_v62 = vadd.f32 %v2016_v21, %v1956_v19  ;;  %v2267_v54 = vadd.f32 %v2266_v46, %v2265_v45  ;;  %v3265_v44 = vpop.permute.xlu1 %951  ;;  %v922_v7 = vpop.permute.xlu0 %921  ;;  %v3268_v1 = vadd.f32 %v1833_v29, %v3182_v3  ;;  %v3270_v0 = vadd.f32 %v2014_v56, %v2013_v37  ;;  %v3596_v21 = vld [vmem:[#allocation20_spill] sm:$0xff]  ;;  %v3597_v29 = vld [vmem:[#allocation69_spill] sm:$0xff]  ;;  %v3599_v56 = vld [vmem:[#allocation35_spill] sm:$0xff] }
 0x255   :  { %3593 = vst [vmem:[#allocation59_spill] sm:$0xff] %v3262_v20  ;;  %v1799_v30 = vadd.f32 %v1767_v57, %v918_v24  ;;  %v1982_v13 = vadd.f32 %v1981_v18, %v1941_v43  ;;  %v3488_v48 = vmax.f32 %v3262_v20, 0.0  ;;  %v2271_v32 = vpop.f32.mrb[28].mxu0  ;;  %v2319_v14 = vpop.f32.mrb[28].mxu1  ;;  %2398 = vpow2.f32 %v2075_v41  ;;  %v3598_v41 = vld [vmem:[#allocation28_spill] sm:$0xff] }
 0x256   :  { %3595 = vst [vmem:[#allocation66_spill] sm:$0xff] %v3270_v0  ;;  %v1710_v4 = vadd.f32 %v2267_v54, %v3596_v21  ;;  %v2315_v52 = vadd.f32 %v2314_v26, %v2313_v35  ;;  %v2272_v24 = vpop.f32.mrb[29].mxu0  ;;  %v2320_v45 = vpop.f32.mrb[29].mxu1  ;;  %v2077_v46 = vmul.f32 1.442695, %v2068_v8  ;;  %v2071_v57 = vsub.f32 0.0, %v3256_v59 }
 0x257   :  { %v1835_v16 = vadd.f32 %v1799_v30, %v1798_v39  ;;  %v1983_v53 = vrot.slane %v1982_v13, 4  ;;  %v1925_v37 = vmul.f32 %v3488_v48, %v3597_v29  ;;  %v3278_v3 = vpop.f32.mrb[30].mxu0  ;;  %v3280_v18 = vpop.f32.mrb[30].mxu1  ;;  %v3600_v35 = vmax.f32 %v3194_v58, 0.0  ;;  %v3601_v8 = vld [vmem:[#allocation36_spill] sm:$0xff]  ;;  %v3604_v59 = vld [vmem:[#allocation19_spill] sm:$0xff] }
 0x258   :  { %v1742_v19 = vmax.f32 %v1710_v4, 0.0  ;;  %v3283_v43 = vadd.f32 %v2315_v52, %v3598_v41  ;;  %v3602_v33 = vmax.f32 %v3164_v15, 0.0  ;;  %v941_v39 = vpop.permute.xlu1 %940  ;;  %v3291_v30 = vpop.permute.xlu0 %955  ;;  %v2072_v54 = vsub.f32 0.0, %v3270_v0  ;;  %v3603_v41 = vld [vmem:[#allocation63_spill] sm:$0xff] }
 0x259   :  { %v1771_v26 = vmul.f32 %v3600_v35, %v3599_v56  ;;  %v1984_v21 = vadd.f32 %v1983_v53, %v1982_v13  ;;  %v1957_v29 = vadd.f32 %v1925_v37, %v3204_v28  ;;  %v2270_v4 = vadd.f32 %v2269_v61, %v2268_v60  ;;  %v2275_v48 = vpop.f32.mrb[31].mxu0  ;;  %v3295_v52 = vpop.f32.mrb[31].mxu1  ;;  %v3605_v13 = vld [vmem:[#allocation78_spill] sm:$0xff] }
 0x25a   :  { %v1770_v9 = vmul.f32 %v3602_v33, %v3601_v8  ;;  %v1910_v40 = vmul.f32 %v1742_v19, %v3603_v41  ;;  %v3299_v15 = vmul.f32 1.442695, %v2071_v57  ;;  %2400 = vpow2.f32 %v2077_v46 }
 0x25b   :  { %v1803_v56 = vadd.f32 %v1771_v26, %v937_v27  ;;  %v1985_v8 = vrot.slane %v1984_v21, 2  ;;  %v2018_v33 = vadd.f32 %v2017_v62, %v1957_v29  ;;  %v1711_v20 = vadd.f32 %v2270_v4, %v3604_v59  ;;  %v3609_v62 = vld [vmem:[#allocation27_spill] sm:$0xff]  ;;  %v3610_v59 = vld [vmem:[#allocation34_spill] sm:$0xff] }
 0x25c   :  { %v1802_v35 = vadd.f32 %v1770_v9, %v933_v11  ;;  %v1942_v53 = vadd.f32 %v1910_v40, %v3605_v13  ;;  %v2318_v60 = vadd.f32 %v2317_v12, %v3236_v22  ;;  %v975_v61 = vpop.permute.xlu1 %974  ;;  %v971_v37 = vpop.permute.xlu0 %970  ;;  %v3304_v0 = vmul.f32 1.442695, %v2072_v54  ;;  %v3607_v11 = vld [vmem:[#allocation72_spill] sm:$0xff]  ;;  %v3612_v4 = vld [vmem:[#allocation62_spill] sm:$0xff] }
 0x25d   :  { %v1986_v41 = vadd.f32 %v1985_v8, %v1984_v21  ;;  %v2019_v58 = vrot.slane %v2018_v33, 4  ;;  %v1743_v27 = vmax.f32 %v1711_v20, 0.0  ;;  %v3608_v57 = vmax.f32 %v3283_v43, 0.0  ;;  %v3614_v13 = vld [vmem:[#allocation22_spill] sm:$0xff] }
 0x25e   :  { %v1844_v28 = vadd.f32 %v1803_v56, %v1802_v35  ;;  %3606 = vst [vmem:[#allocation68_spill] sm:$0xff] %v3304_v0  ;;  %v3310_v9 = vadd.f32 %v2318_v60, %v3609_v62  ;;  %v3611_v40 = vmax.f32 %v3120_v63, 0.0  ;;  %v2273_v29 = vadd.f32 %v2272_v24, %v2271_v32  ;;  %v3613_v56 = vld [vmem:[#allocation40_spill] sm:$0xff]  ;;  %v3615_v32 = vld [vmem:[#allocation81_spill] sm:$0xff] }
 0x25f   :  { %v1926_v26 = vmul.f32 %v3608_v57, %v3607_v11  ;;  %v1987_v22 = vrot.slane %v1986_v41, 1  ;;  %v2020_v12 = vadd.f32 %v2019_v58, %v2018_v33  ;;  %v1911_v54 = vmul.f32 %v1743_v27, %v3612_v4  ;;  %v2399_v20 = vpop.eup %2398  ;;  %v3616_v58 = vld [vmem:[#allocation38_spill] sm:$0xff] }
 0x260   :  { %v1768_v46 = vmul.f32 %v3611_v40, %v3610_v59  ;;  %v1774_v21 = vmul.f32 %v1742_v19, %v3613_v56  ;;  %v1759_v35 = vmax.f32 %v3310_v9, 0.0  ;;  %v1712_v11 = vadd.f32 %v2273_v29, %v3614_v13  ;;  %v960_v57 = vpop.permute.xlu1 %959  ;;  %v926_v62 = vpop.permute.xlu0 %925  ;;  %v3618_v19 = vld [vmem:[#allocation71_spill] sm:$0xff] }
 0x261   :  { %v2321_v60 = vadd.f32 %v2320_v45, %v2319_v14  ;;  %v3319_v0 = vadd.f32 %v1987_v22, %v1986_v41  ;;  %v2021_v63 = vrot.slane %v2020_v12, 2  ;;  %v1943_v24 = vadd.f32 %v1911_v54, %v3615_v32 }
 0x262   :  { %v1800_v8 = vadd.f32 %v1768_v46, %v922_v7  ;;  %v3617_v33 = vmax.f32 %v3215_v51, 0.0  ;;  %v1927_v40 = vmul.f32 %v1759_v35, %v3618_v19  ;;  %v1744_v7 = vmax.f32 %v1712_v11, 0.0  ;;  %v3619_v46 = vld [vmem:[#allocation30_spill] sm:$0xff]  ;;  %v3620_v51 = vld [vmem:[#allocation65_spill] sm:$0xff] }
 0x263   :  { %v3329_v29 = vadd.f32 %v2321_v60, %v3619_v46  ;;  %v2069_v14 = vsub.f32 0.0, %v3319_v0  ;;  %v1958_v45 = vadd.f32 %v1926_v26, %v3131_v50  ;;  %v1989_v41 = vadd.f32 %v1943_v24, %v1942_v53  ;;  %v3621_v60 = vld [vmem:[#allocation39_spill] sm:$0xff]  ;;  %v3622_v26 = vld [vmem:[#allocation74_spill] sm:$0xff]  ;;  %v3623_v24 = vld [vmem:[#allocation21_spill] sm:$0xff] }
 0x264   :  { %v1772_v59 = vmul.f32 %v3617_v33, %v3616_v58  ;;  %v1836_v4 = vadd.f32 %v1835_v16, %v1800_v8  ;;  %v1806_v22 = vadd.f32 %v1774_v21, %v3265_v44  ;;  %v1959_v54 = vadd.f32 %v1927_v40, %v3160_v10  ;;  %v994_v58 = vpop.permute.xlu1 %993  ;;  %v990_v16 = vpop.permute.xlu0 %989 }
 0x265   :  { %v1912_v56 = vmul.f32 %v1744_v7, %v3620_v51  ;;  %v1760_v13 = vmax.f32 %v3329_v29, 0.0  ;;  %v2079_v8 = vmul.f32 1.442695, %v2069_v14  ;;  %v3337_v11 = vadd.f32 %v2021_v63, %v2020_v12  ;;  %v2401_v50 = vpop.eup %2400  ;;  %v3624_v14 = vld [vmem:[#allocation29_spill] sm:$0xff] }
 0x266   :  { %v1804_v32 = vadd.f32 %v1772_v59, %v941_v39  ;;  %v1775_v33 = vmul.f32 %v1743_v27, %v3621_v60  ;;  %v2276_v19 = vadd.f32 %v2275_v48, %v3278_v3  ;;  %v2025_v53 = vadd.f32 %v1959_v54, %v1958_v45 }
 0x267   :  { %v1944_v44 = vadd.f32 %v1912_v56, %v3061_v36  ;;  %v1928_v10 = vmul.f32 %v1760_v13, %v3622_v26  ;;  %2402 = vpow2.f32 %v2079_v8  ;;  %v2324_v12 = vadd.f32 %v3295_v52, %v3280_v18  ;;  %v3626_v18 = vld [vmem:[#allocation33_spill] sm:$0xff] }
 0x268   :  { %v1845_v21 = vadd.f32 %v1844_v28, %v1804_v32  ;;  %v1807_v39 = vadd.f32 %v1775_v33, %v3291_v30  ;;  %v1713_v59 = vadd.f32 %v2276_v19, %v3623_v24  ;;  %v1811_v3 = vadd.f32 %v3154_v47, %v975_v61  ;;  %v979_v63 = vpop.permute.xlu1 %978  ;;  %v945_v40 = vpop.permute.xlu0 %944  ;;  %v3625_v30 = vld [vmem:[#allocation42_spill] sm:$0xff]  ;;  %v3628_v47 = vld [vmem:[#allocation64_spill] sm:$0xff] }
 0x269   :  { %v1990_v27 = vadd.f32 %v1989_v41, %v1944_v44  ;;  %v1960_v48 = vadd.f32 %v1928_v10, %v3206_v17  ;;  %v1810_v36 = vadd.f32 %v3146_v31, %v971_v37  ;;  %v3353_v45 = vadd.f32 %v2324_v12, %v3624_v14  ;;  %v3631_v33 = vld [vmem:[#allocation46_spill] sm:$0xff] }
 0x26a   :  { %v1853_v46 = vadd.f32 %v1807_v39, %v1806_v22  ;;  %v1745_v28 = vmax.f32 %v1713_v59, 0.0  ;;  %v1776_v54 = vmul.f32 %v1744_v7, %v3625_v30  ;;  %v3627_v52 = vmax.f32 %v3129_v5, 0.0  ;;  %v3629_v22 = vld [vmem:[#allocation45_spill] sm:$0xff] }
 0x26b   :  { %v2026_v51 = vadd.f32 %v2025_v53, %v1960_v48  ;;  %v1862_v56 = vadd.f32 %v1811_v3, %v1810_v36  ;;  %v2099_v17 = vsel %vm2042_vm0, %v2401_v50, %v2399_v20  ;;  %v1761_v31 = vmax.f32 %v3353_v45, 0.0  ;;  %v3633_v5 = vld [vmem:[#allocation37_spill] sm:$0xff] }
 0x26c   :  { %v1769_v41 = vmul.f32 %v3627_v52, %v3626_v18  ;;  %v1913_v61 = vmul.f32 %v1745_v28, %v3628_v47  ;;  %v1808_v37 = vadd.f32 %v1776_v54, %v960_v57  ;;  %v3630_v32 = vmax.f32 %v3089_v25, 0.0  ;;  %v1013_v50 = vpop.permute.xlu1 %1012  ;;  %v1009_v26 = vpop.permute.xlu0 %1008  ;;  %v3635_v57 = vld [vmem:[#allocation73_spill] sm:$0xff] }
 0x26d   :  { %v3632_v7 = vmax.f32 %v3077_v42, 0.0  ;;  %v1812_v53 = vadd.f32 %v3177_v6, %v979_v63  ;;  %v3634_v44 = vmax.f32 %v3223_v34, 0.0  ;;  %v1929_v25 = vmul.f32 %v1761_v31, %v3635_v57  ;;  %v3636_v34 = vld [vmem:[#allocation49_spill] sm:$0xff]  ;;  %v3638_v63 = vld [vmem:[#allocation50_spill] sm:$0xff] }
 0x26e   :  { %v1783_v8 = vmul.f32 %v3630_v32, %v3629_v22  ;;  %v1801_v60 = vadd.f32 %v1769_v41, %v926_v62  ;;  %v1945_v10 = vadd.f32 %v1913_v61, %v3110_v49  ;;  %v1854_v39 = vadd.f32 %v1853_v46, %v1808_v37  ;;  %v3642_v32 = vld [vmem:[#allocation41_spill] sm:$0xff] }
 0x26f   :  { %v1782_v19 = vmul.f32 %v3632_v7, %v3631_v33  ;;  %v1773_v20 = vmul.f32 %v3634_v44, %v3633_v5  ;;  %v3376_v42 = vadd.f32 %v1862_v56, %v1812_v53  ;;  %v1961_v48 = vadd.f32 %v1929_v25, %v3225_v23 }
 0x270   :  { %v1815_v62 = vadd.f32 %v1783_v8, %v994_v58  ;;  %v1837_v24 = vadd.f32 %v1836_v4, %v1801_v60  ;;  %v1991_v6 = vadd.f32 %v1990_v27, %v1945_v10  ;;  %v3637_v3 = vmax.f32 %v3197_v55, 0.0  ;;  %v998_v58 = vpop.permute.xlu1 %997  ;;  %v3640_v4 = vld [vmem:[#allocation48_spill] sm:$0xff] }
 0x271   :  { %v1814_v59 = vadd.f32 %v1782_v19, %v990_v16  ;;  %v1805_v12 = vadd.f32 %v1773_v20, %v945_v40  ;;  %v3639_v49 = vmax.f32 %v3168_v2, 0.0  ;;  %v3641_v16 = vmax.f32 %v3123_v38, 0.0  ;;  %v964_v40 = vpop.permute.xlu0 %963  ;;  %v2403_v27 = vpop.eup %2402  ;;  %v3643_v19 = vld [vmem:[#allocation53_spill] sm:$0xff] }
 0x272   :  { %v1787_v36 = vmul.f32 %v3637_v3, %v3636_v34  ;;  %v1838_v30 = vrot.slane %v1837_v24, 4  ;;  %v1992_v18 = vrot.slane %v1991_v6, 4  ;;  %v2027_v23 = vadd.f32 %v2026_v51, %v1961_v48  ;;  %v3646_v48 = vld [vmem:[#allocation52_spill] sm:$0xff]  ;;  %v3647_v34 = vld [vmem:[#allocation57_spill] sm:$0xff] }
 0x273   :  { %v1786_v14 = vmul.f32 %v3639_v49, %v3638_v63  ;;  %v1871_v54 = vadd.f32 %v1815_v62, %v1814_v59  ;;  %v1846_v46 = vadd.f32 %v1845_v21, %v1805_v12  ;;  %v1784_v56 = vmul.f32 %v3641_v16, %v3640_v4  ;;  %v3649_v49 = vld [vmem:[#allocation56_spill] sm:$0xff] }
 0x274   :  { %v1819_v52 = vadd.f32 %v1787_v36, %v1013_v50  ;;  %v1839_v55 = vadd.f32 %v1838_v30, %v1837_v24  ;;  %v3389_v61 = vsel %vm2044_vm1, %v2403_v27, %v2099_v17  ;;  %v1993_v37 = vadd.f32 %v1992_v18, %v1991_v6  ;;  %v1032_v7 = vpop.permute.xlu1 %1031  ;;  %v3644_v17 = vld [vmem:[#allocation54_spill] sm:$0xff]  ;;  %v3653_v27 = vld [vmem:[#allocation16_spill] sm:$0xff] }
 0x275   :  { %v1818_v41 = vadd.f32 %v1786_v14, %v1009_v26  ;;  %v1847_v47 = vrot.slane %v1846_v46, 4  ;;  %v1816_v2 = vadd.f32 %v1784_v56, %v998_v58  ;;  %v2028_v22 = vrot.slane %v2027_v23, 4  ;;  %v1028_v53 = vpop.permute.xlu0 %1027  ;;  %v3651_v58 = vld [vmem:[#allocation82_spill] sm:$0xff] }
 0x276   :  { %v1777_v8 = vmul.f32 %v1745_v28, %v3642_v32  ;;  %v1840_v60 = vrot.slane %v1839_v55, 2  ;;  %v1791_v51 = vmul.f32 %v1759_v35, %v3643_v19  ;;  %v1994_v5 = vrot.slane %v1993_v37, 2  ;;  %v3656_v19 = vld [vmem:[#allocation59_spill] sm:$0xff] }
 0x277   :  { %v1880_v21 = vadd.f32 %v1819_v52, %v1818_v41  ;;  %v1848_v38 = vadd.f32 %v1847_v47, %v1846_v46  ;;  %v1872_v33 = vadd.f32 %v1871_v54, %v1816_v2  ;;  %v2029_v44 = vadd.f32 %v2028_v22, %v2027_v23  ;;  %v3650_v46 = vld [vmem:[#allocation47_spill] sm:$0xff] }
 0x278   :  { %v1809_v20 = vadd.f32 %v1777_v8, %v964_v40  ;;  %v3645_v50 = vmax.f32 %v3283_v43, 0.0  ;;  %v2023_v10 = vrot.slane %v3337_v11, 1  ;;  %v1841_v57 = vadd.f32 %v1840_v60, %v1839_v55  ;;  %v1017_v35 = vpop.permute.xlu1 %1016  ;;  %v3654_v55 = vld [vmem:[#allocation55_spill] sm:$0xff] }
 0x279   :  { %v1849_v28 = vrot.slane %v1848_v38, 2  ;;  %v1823_v25 = vadd.f32 %v1791_v51, %v1032_v7  ;;  %v1995_v62 = vadd.f32 %v1994_v5, %v1993_v37  ;;  %v2030_v24 = vrot.slane %v2029_v44, 2  ;;  %v983_v63 = vpop.permute.xlu0 %982  ;;  %v3655_v7 = vld [vmem:[#allocation51_spill] sm:$0xff] }
 0x27a   :  { %v1790_v26 = vmul.f32 %v3645_v50, %v3644_v17  ;;  %v1855_v59 = vadd.f32 %v1854_v39, %v1809_v20  ;;  %v1842_v6 = vrot.slane %v1841_v57, 1  ;;  %v3648_v3 = vmax.f32 %v3647_v34, 0.0 }
 0x27b   :  { %v1850_v9 = vadd.f32 %v1849_v28, %v1848_v38  ;;  %v1792_v43 = vmul.f32 %v1760_v13, %v3649_v49  ;;  %v1996_v14 = vrot.slane %v1995_v62, 1  ;;  %v3652_v4 = vmax.f32 %v3651_v58, 0.0 }
 0x27c   :  { %v1822_v12 = vadd.f32 %v1790_v26, %v1028_v53  ;;  %v1788_v36 = vmul.f32 %v3648_v3, %v3646_v48  ;;  %v1856_v30 = vrot.slane %v1855_v59, 4  ;;  %v1843_v16 = vadd.f32 %v1842_v6, %v1841_v57  ;;  %v1036_v22 = vpop.permute.xlu1 %1035  ;;  %v3658_v6 = vld [vmem:[#allocation68_spill] sm:$0xff] }
 0x27d   :  { %v1785_v39 = vmul.f32 %v3652_v4, %v3650_v46  ;;  %v1851_v56 = vrot.slane %v1850_v9, 1  ;;  %v1813_v18 = vadd.f32 %v3653_v27, %v983_v63  ;;  %v3409_v23 = vadd.f32 %v1996_v14, %v1995_v62  ;;  %v1002_v32 = vpop.permute.xlu0 %1001 }
 0x27e   :  { %v1889_v54 = vadd.f32 %v1823_v25, %v1822_v12  ;;  %v1820_v40 = vadd.f32 %v1788_v36, %v1017_v35  ;;  %v2031_v52 = vadd.f32 %v2030_v24, %v2029_v44  ;;  %v1857_v41 = vadd.f32 %v1856_v30, %v1855_v59 }
 0x27f   :  { %v1793_v29 = vmul.f32 %v1761_v31, %v3654_v55  ;;  %v2043_v13 = vsel %vm2042_vm0, %v1843_v16, %v3268_v1  ;;  %v1852_v47 = vadd.f32 %v1851_v56, %v1850_v9  ;;  %v1864_v37 = vadd.f32 %v3376_v42, %v1813_v18 }
 0x280   :  { %v1881_v2 = vadd.f32 %v1880_v21, %v1820_v40  ;;  %v2070_v8 = vsub.f32 0.0, %v3409_v23  ;;  %v1858_v60 = vrot.slane %v1857_v41, 2  ;;  %v1824_v38 = vadd.f32 %v1792_v43, %v1036_v22  ;;  %v1040_v26 = vpop.permute.xlu1 %1039 }
 0x281   :  { %v3657_v51 = vmax.f32 %v3656_v19, 0.0  ;;  %v2045_v45 = vsel %vm2044_vm1, %v1852_v47, %v2043_v13  ;;  %v1865_v31 = vrot.slane %v1864_v37, 4  ;;  %v1817_v5 = vadd.f32 %v1785_v39, %v1002_v32  ;;  %v1021_v57 = vpop.permute.xlu0 %1020 }
 0x282   :  { %v3423_v1 = vadd.f32 %v2023_v10, %v3337_v11  ;;  %v2081_v21 = vmul.f32 1.442695, %v2070_v8  ;;  %v1859_v44 = vadd.f32 %v1858_v60, %v1857_v41  ;;  %v1890_v42 = vadd.f32 %v1889_v54, %v1824_v38  ;;  %v121_v38 = vld [vmem:[#allocation5] sm:$0xff] }
 0x283   :  { %v1789_v53 = vmul.f32 %v3657_v51, %v3655_v7  ;;  %v2032_v20 = vrot.slane %v2031_v52, 1  ;;  %2404 = vpow2.f32 %v3299_v15  ;;  %v1866_v17 = vadd.f32 %v1865_v31, %v1864_v37 }
 0x284   :  { %v1873_v50 = vadd.f32 %v1872_v33, %v1817_v5  ;;  %v2073_v28 = vsub.f32 0.0, %v3423_v1  ;;  %2406 = vpow2.f32 %v2081_v21  ;;  %v1860_v25 = vrot.slane %v1859_v44, 1  ;;  %v3659_v5 = vld [vmem:[#allocation79_spill] sm:$0xff] }
 0x285   :  { %v1825_v62 = vadd.f32 %v1793_v29, %v1040_v26  ;;  %v1821_v24 = vadd.f32 %v1789_v53, %v1021_v57  ;;  %v1867_v59 = vrot.slane %v1866_v17, 2  ;;  %v2033_v11 = vadd.f32 %v2032_v20, %v2031_v52  ;;  %v3661_v20 = vld [vmem:[#allocation24_spill] sm:$0xff] }
 0x286   :  { %v1874_v12 = vrot.slane %v1873_v50, 4  ;;  %v2087_v10 = vmul.f32 1.442695, %v2073_v28  ;;  %2408 = vpow2.f32 %v3658_v6  ;;  %v1861_v9 = vadd.f32 %v1860_v25, %v1859_v44  ;;  %v3660_v44 = vld [vmem:[#allocation44_spill] sm:$0xff] }
 0x287   :  { %v1891_v35 = vadd.f32 %v1890_v42, %v1825_v62  ;;  %v1882_v48 = vadd.f32 %v1881_v2, %v1821_v24  ;;  %v1868_v15 = vadd.f32 %v1867_v59, %v1866_v17  ;;  %v2074_v33 = vsub.f32 0.0, %v2033_v11 }
 0x288   :  { %v1875_v34 = vadd.f32 %v1874_v12, %v1873_v50  ;;  %v2047_v3 = vsel %vm2046_vm2, %v1861_v9, %v2045_v45  ;;  %2410 = vpow2.f32 %v2087_v10  ;;  %v2058_v21 = vadd.f32 1.837877, %v3659_v5  ;;  %v3662_v50 = vld [vmem:[#allocation66_spill] sm:$0xff] }
 0x289   :  { %v1892_v36 = vrot.slane %v1891_v35, 4  ;;  %v1883_v63 = vrot.slane %v1882_v48, 4  ;;  %v1869_v49 = vrot.slane %v1868_v15, 1  ;;  %v2089_v14 = vmul.f32 1.442695, %v2074_v33 }
 0x28a   :  { %v1876_v43 = vrot.slane %v1875_v34, 2  ;;  %v2062_v42 = vadd.f32 1.837877, %v3660_v44  ;;  %v2059_v17 = vadd.f32 1.837877, %v3661_v20 }
 0x28b   :  { %v1893_v30 = vadd.f32 %v1892_v36, %v1891_v35  ;;  %v1884_v54 = vadd.f32 %v1883_v63, %v1882_v48  ;;  %v1870_v46 = vadd.f32 %v1869_v49, %v1868_v15  ;;  %2412 = vpow2.f32 %v2089_v14 }
 0x28c   :  { %v1877_v58 = vadd.f32 %v1876_v43, %v1875_v34  ;;  %v2063_v26 = vadd.f32 1.837877, %v3662_v50  ;;  %v2060_v57 = vadd.f32 1.837877, %v3319_v0  ;;  %v2061_v25 = vadd.f32 1.837877, %v3409_v23 }
 0x28d   :  { %v1894_v4 = vrot.slane %v1893_v30, 2  ;;  %v1885_v39 = vrot.slane %v1884_v54, 2  ;;  %v2405_v16 = vpop.eup %2404  ;;  %v2049_v40 = vsel %vm2048_vm3, %v1870_v46, %v2047_v3  ;;  %v2064_v62 = vadd.f32 1.837877, %v3423_v1 }
 0x28e   :  { %v1878_v56 = vrot.slane %v1877_v58, 1  ;;  %v2407_v27 = vpop.eup %2406  ;;  %v2065_v24 = vadd.f32 1.837877, %v2033_v11 }
 0x28f   :  { %v1895_v18 = vadd.f32 %v1894_v4, %v1893_v30  ;;  %v1886_v52 = vadd.f32 %v1885_v39, %v1884_v54  ;;  %v2101_v55 = vsel %vm2046_vm2, %v2407_v27, %v3389_v61 }
 0x290   :  { %v1879_v41 = vadd.f32 %v1878_v56, %v1877_v58  ;;  %v2409_v29 = vpop.eup %2408  ;;  %v2102_v2 = vsel %vm2048_vm3, %v2405_v16, %v2101_v55 }
 0x291   :  { %v1896_v13 = vrot.slane %v1895_v18, 1  ;;  %v1887_v47 = vrot.slane %v1886_v52, 1  ;;  %v2103_v22 = vsel %vm2050_vm4, %v2409_v29, %v2102_v2 }
 0x292   :  { %v2051_v37 = vsel %vm2050_vm4, %v1879_v41, %v2049_v40  ;;  %v2411_v32 = vpop.eup %2410 }
 0x293   :  { %v1897_v8 = vadd.f32 %v1896_v13, %v1895_v18  ;;  %v1888_v60 = vadd.f32 %v1887_v47, %v1886_v52  ;;  %v2104_v7 = vsel %vm2052_vm5, %v2411_v32, %v2103_v22 }
 0x295   :  { %v2053_v19 = vsel %vm2052_vm5, %v1888_v60, %v2051_v37  ;;  %v2413_v61 = vpop.eup %2412 }
 0x296   :  { %v2055_v51 = vsel %vm2054_vm6, %v1897_v8, %v2053_v19  ;;  %v2105_v45 = vsel %vm2054_vm6, %v2413_v61, %v2104_v7 }
 0x297   :  { %v2057_v53 = vsub.f32 %v121_v38, %v2055_v51 }
 0x299   :  { %v2066_v31 = vmul.f32 %v2057_v53, %v2057_v53 }
 0x29b   :  { %v2107_v28 = vmul.f32 %v2105_v45, %v2066_v31 }
 0x29d   :  { %v2109_v59 = vrot.slane %v2107_v28, 1  ;;  %v2110_v12 = vrot.slane %v2107_v28, 2  ;;  %v2111_v10 = vrot.slane %v2107_v28, 3  ;;  %v2112_v6 = vrot.slane %v2107_v28, 4 }
 0x29e   :  { %v2113_v9 = vrot.slane %v2107_v28, 5  ;;  %v2114_v35 = vrot.slane %v2107_v28, 6  ;;  %v2115_v48 = vrot.slane %v2107_v28, 7  ;;  %v2124_v15 = vadd.f32 %v2107_v28, %v2058_v21 }
 0x29f   :  { %v2125_v34 = vadd.f32 %v2109_v59, %v2059_v17  ;;  %v2126_v33 = vadd.f32 %v2110_v12, %v2060_v57  ;;  %v2127_v3 = vadd.f32 %v2111_v10, %v2061_v25  ;;  %v2128_v36 = vadd.f32 %v2112_v6, %v2062_v42 }
 0x2a0   :  { %v2129_v63 = vadd.f32 %v2113_v9, %v2063_v26  ;;  %v2130_v0 = vadd.f32 %v2114_v35, %v2064_v62  ;;  %v2131_v49 = vadd.f32 %v2115_v48, %v2065_v24  ;;  %v2132_v11 = vmul.f32 -0.5, %v2124_v15 }
 0x2a1   :  { %v2133_v43 = vmul.f32 -0.5, %v2125_v34  ;;  %v2134_v23 = vmul.f32 -0.5, %v2126_v33  ;;  %v2135_v14 = vmul.f32 -0.5, %v2127_v3  ;;  %v2136_v1 = vmul.f32 -0.5, %v2128_v36 }
 0x2a2   :  { %v2137_v30 = vmul.f32 -0.5, %v2129_v63  ;;  %v2138_v58 = vmul.f32 -0.5, %v2130_v0  ;;  %v2139_v4 = vmul.f32 -0.5, %v2131_v49 }
 0x2a3   :  { %v2148_v54 = vrot.slane %v2133_v43, 7  ;;  %v2150_v46 = vrot.slane %v2134_v23, 6  ;;  %v2152_v16 = vrot.slane %v2135_v14, 5  ;;  %v2154_v40 = vrot.slane %v2136_v1, 4 }
 0x2a4   :  { %v2156_v18 = vrot.slane %v2137_v30, 3  ;;  %v2158_v41 = vrot.slane %v2138_v58, 2  ;;  %v2160_v29 = vrot.slane %v2139_v4, 1 }
 0x2a5   :  { %v2149_v39 = vsel %vm2042_vm0, %v2148_v54, %v2132_v11 }
 0x2a6   :  { %v2151_v56 = vsel %vm2044_vm1, %v2150_v46, %v2149_v39 }
 0x2a7   :  { %v2153_v27 = vsel %vm2046_vm2, %v2152_v16, %v2151_v56 }
 0x2a8   :  { %v2155_v52 = vsel %vm2048_vm3, %v2154_v40, %v2153_v27 }
 0x2a9   :  { %v2157_v55 = vsel %vm2050_vm4, %v2156_v18, %v2155_v52 }
 0x2aa   :  { %v2159_v13 = vsel %vm2052_vm5, %v2158_v41, %v2157_v55 }
 0x2ab   :  { %v2161_v47 = vsel %vm2054_vm6, %v2160_v29, %v2159_v13 }
 0x2ac   :  { %2163 = vst [vmem:[#allocation10] sm:$0xff] %v2161_v47 }
 0x2ad   :  { %2513 = shalt.err (!%p2510_p8)
}
 0x2ae   :  { %s2514_s13 = scalar_lea.hbm %s3469_s4, 128 }
 0x2af   :  { %p2515_p9 = scmp.ne.s32.totalorder %s3469_s4, %s2514_s13  ;;  %p2518_p10 = scmp.lt.u32.totalorder %s2514_s13, %s3469_s4 }
 0x2b1   :  { %p2520_p11 = pnand %p2518_p10, %p2515_p9 }
 0x2b3   :  { %2523 = shalt.err (!%p2520_p11)
}
 0x2b4   :  { %2173 = dma.vmem_to_hbm [thread:$0]  %s2171_s10, 128, %s3469_s4, [#allocation4]  }
 0x2b5   :  { %2530 = dma.done.wait [#allocation4], 128  }
 0x2b6   :  { %2531 = vsyncadd [#allocation4], 4294967168 }
 0x2b7   :  { %2177 = vsyncpa [#allocation3], 1 }
 0x2b8   :  { %2178 = vsyncpa [#allocation6], 1 }
 0x2b9   :  { %2179 = vsyncpa [#allocation9], 1 }
 0x2ba   :  { %2180 = vsyncpa [#allocation4], 1 }

</bundles_post_ra>
